<compile_context>
chip_gen: v7x
topology: tpu7x:2x2x1
jax: 0.10.0
libtpu: 0.0.40
codegen_flags: <defaults>
</compile_context>

<pallas_src>
import functools

import jax
import jax.numpy as jnp
import numpy as np
from jax.experimental import pallas as pl
from jax.experimental.pallas import tpu as pltpu


# ----------------------------------------------------------------------------
# Pallas kernel: fused [3x3 s2 conv -> +bias -> LeakyReLU -> 1x1 conv -> +bias
#                       -> LeakyReLU] for one (batch, row-block) tile.
# ----------------------------------------------------------------------------
def _stage_kernel(x_ref, halo_ref, w3_ref, b3_ref, w1_ref, b1_ref, o_ref, *,
                  th, wo, c_in, slope=0.2):
    # x_ref   : (1, th, 2, wo+1, 2*c_in)  bf16  -- row-pairs r0..r0+th-1 of the
    #                                              padded input (both row parities,
    #                                              column pairs packed into channels)
    # halo_ref: (1, 1,  2, wo+1, 2*c_in)  bf16  -- row-pair r0+th (bottom halo)
    # w3_ref  : (9, c_in, c1)             bf16  -- per-tap 3x3 weights, BN scale folded
    # b3_ref  : (1, c1)                   f32
    # w1_ref  : (c1, c2)                  bf16  -- 1x1 weights, BN scale folded
    # b1_ref  : (1, c2)                   f32
    # o_ref   : (1, th, wo, c2)           f32
    c1 = w3_ref.shape[2]
    c2 = w1_ref.shape[1]

    xa = x_ref[0]          # (th, 2, wo+1, 2*c_in)
    xb = halo_ref[0]       # (1,  2, wo+1, 2*c_in)

    # Row slabs for the three kernel-row taps kh = 0,1,2 : padded rows 2*oh + kh.
    row0 = xa[:, 0]                                            # (th, wo+1, 2*c_in)
    row1 = xa[:, 1]
    if th > 1:
        row2 = jnp.concatenate([xa[1:, 0], xb[:, 0]], axis=0)  # (th, wo+1, 2*c_in)
    else:
        row2 = xb[:, 0]
    rows = (row0, row1, row2)

    # In-kernel im2col: 9 tap matmuls accumulated in f32 (bf16 MXU inputs).
    acc = jnp.zeros((th * wo, c1), jnp.float32)
    for kh in range(3):
        for kw in range(3):
            s0 = kw // 2              # column-pair offset
            q0 = (kw % 2) * c_in      # even / odd column within the pair
            slab = rows[kh][:, s0:s0 + wo, q0:q0 + c_in]       # (th, wo, c_in)
            acc = acc + jnp.dot(slab.reshape(th * wo, c_in),
                                w3_ref[3 * kh + kw],
                                preferred_element_type=jnp.float32)

    # Folded BN bias + LeakyReLU(0.2)  (BN scale already folded into w3).
    h = acc + b3_ref[...]
    h = jnp.where(h > 0, h, slope * h)

    # Fused 1x1 conv + folded BN bias + LeakyReLU(0.2).
    y = jnp.dot(h.astype(w1_ref.dtype), w1_ref[...],
                preferred_element_type=jnp.float32)
    y = y + b1_ref[...]
    y = jnp.where(y > 0, y, slope * y)

    o_ref[...] = y.reshape(1, th, wo, c2).astype(o_ref.dtype)


# ----------------------------------------------------------------------------
# Wrapper: one fused stage (conv3x3 s2 p1 + BN + LReLU + conv1x1 + BN + LReLU).
# ----------------------------------------------------------------------------
def _fused_stage(x_nhwc, w3_oihw, s3, b3, w1_oihw, s1, b1, *,
                 compute_dtype=jnp.bfloat16):
    n, h, w, c = x_nhwc.shape
    ho = (h - 1) // 2 + 1          # = ceil(H/2), matches PyTorch conv(s=2, p=1)
    wo = (w - 1) // 2 + 1
    c1 = w3_oihw.shape[0]
    c2 = w1_oihw.shape[0]

    # Zero-pad so every 3x3/stride-2 tap is in-bounds, then view row/column
    # pairs so the stride-2 taps become plain block slices (pure reshape).
    xp = jnp.pad(x_nhwc, ((0, 0), (1, 2 * ho + 1 - h), (1, 2 * wo + 1 - w), (0, 0)))
    xr = xp.astype(compute_dtype).reshape(n, ho + 1, 2, wo + 1, 2 * c)

    # Fold the eval-mode BatchNorm scale into the conv weights (bias stays).
    w9 = (jnp.transpose(w3_oihw, (2, 3, 1, 0)) * s3[None, None, None, :]
          ).reshape(9, c, c1).astype(compute_dtype)
    wp = (jnp.transpose(w1_oihw[:, :, 0, 0], (1, 0)) * s1[None, :]).astype(compute_dtype)
    b3r = b3.reshape(1, c1).astype(jnp.float32)
    b1r = b1.reshape(1, c2).astype(jnp.float32)

    # ~2K output pixels per grid step (large GEMM M, amortises per-step
    # overhead) while keeping double-buffered blocks a few MiB at most.
    th = max(1, min(ho, 2048 // max(wo, 1)))
    n_rb = pl.cdiv(ho, th)

    kernel = functools.partial(_stage_kernel, th=th, wo=wo, c_in=c)
    out = pl.pallas_call(
        kernel,
        out_shape=jax.ShapeDtypeStruct((n, ho, wo, c2), jnp.float32),
        grid=(n, n_rb),
        in_specs=[
            # main row-block of the padded activation
            pl.BlockSpec((1, th, 2, wo + 1, 2 * c),
                         lambda i, r: (i, r, 0, 0, 0)),
            # bottom-halo row-pair (block size 1 => block index == row-pair index)
            pl.BlockSpec((1, 1, 2, wo + 1, 2 * c),
                         lambda i, r: (i, jnp.minimum((r + 1) * th, ho), 0, 0, 0)),
            # weights / biases: constant index -> fetched once, stay resident
            pl.BlockSpec((9, c, c1), lambda i, r: (0, 0, 0)),
            pl.BlockSpec((1, c1), lambda i, r: (0, 0)),
            pl.BlockSpec((c1, c2), lambda i, r: (0, 0)),
            pl.BlockSpec((1, c2), lambda i, r: (0, 0)),
        ],
        out_specs=pl.BlockSpec((1, th, wo, c2), lambda i, r: (i, r, 0, 0)),
        compiler_params=pltpu.CompilerParams(
            dimension_semantics=("parallel", "parallel")),
    )(xr, xr, w9, b3r, wp, b1r)
    return out


# ----------------------------------------------------------------------------
# Parameter init (deterministic, synthetic) and full module forward.
# ----------------------------------------------------------------------------
def _fold_bn(gamma, beta, mean, var, eps=1e-5):
    scale = gamma / jnp.sqrt(var + eps)
    bias = beta - mean * scale
    return scale, bias


def init_params(key, in_channel=32):
    c1, c2 = in_channel * 2, in_channel * 4
    keys = iter(jax.random.split(key, 24))

    def bn(c):
        gamma = 1.0 + 0.1 * jax.random.normal(next(keys), (c,), jnp.float32)
        beta = 0.1 * jax.random.normal(next(keys), (c,), jnp.float32)
        mean = 0.05 * jax.random.normal(next(keys), (c,), jnp.float32)
        var = 1.0 + 0.1 * jax.random.uniform(next(keys), (c,), jnp.float32)
        return _fold_bn(gamma, beta, mean, var)

    p = {}
    p["w1a"] = 0.1 * jax.random.normal(next(keys), (c1, in_channel, 3, 3), jnp.float32)
    p["s1a"], p["b1a"] = bn(c1)
    p["w1b"] = 0.1 * jax.random.normal(next(keys), (c1, c1, 1, 1), jnp.float32)
    p["s1b"], p["b1b"] = bn(c1)
    p["w2a"] = 0.1 * jax.random.normal(next(keys), (c2, c1, 3, 3), jnp.float32)
    p["s2a"], p["b2a"] = bn(c2)
    p["w2b"] = 0.1 * jax.random.normal(next(keys), (c2, c2, 1, 1), jnp.float32)
    p["s2b"], p["b2b"] = bn(c2)
    return p


def feature_pyramid_forward(x_nchw, p):
    """Returns [x, out1, out2], each NCHW (PyTorch convention)."""
    x_nhwc = jnp.transpose(x_nchw, (0, 2, 3, 1))  # NHWC for the kernels
    out1 = _fused_stage(x_nhwc, p["w1a"], p["s1a"], p["b1a"],
                        p["w1b"], p["s1b"], p["b1b"])
    out2 = _fused_stage(out1, p["w2a"], p["s2a"], p["b2a"],
                        p["w2b"], p["s2b"], p["b2b"])
    return [x_nchw.transpose(0, 1, 2, 3) if False else x_nchw,
            jnp.transpose(out1, (0, 3, 1, 2)),
            jnp.transpose(out2, (0, 3, 1, 2))]


# ----------------------------------------------------------------------------
# Pure-JAX reference (mirrors the kernel's bf16-on-MXU / f32-accumulation).
# ----------------------------------------------------------------------------
def reference_forward(x_nchw, p, compute_dtype=jnp.bfloat16):
    def conv(x, w, stride, pad):
        return jax.lax.conv_general_dilated(
            x.astype(compute_dtype), w.astype(compute_dtype),
            window_strides=(stride, stride), padding=((pad, pad), (pad, pad)),
            dimension_numbers=("NCHW", "OIHW", "NCHW"),
            preferred_element_type=jnp.float32)

    def stage(x, w3, s3, b3, w1, s1, b1):
        w3f = w3 * s3[:, None, None, None]   # same BN-scale folding as kernel path
        w1f = w1 * s1[:, None, None, None]
        y = conv(x, w3f, 2, 1) + b3[None, :, None, None]
        y = jnp.where(y > 0, y, 0.2 * y)
        y = conv(y, w1f, 1, 0) + b1[None, :, None, None]
        return jnp.where(y > 0, y, 0.2 * y)

    out1 = stage(x_nchw, p["w1a"], p["s1a"], p["b1a"], p["w1b"], p["s1b"], p["b1b"])
    out2 = stage(out1, p["w2a"], p["s2a"], p["b2a"], p["w2b"], p["s2b"], p["b2b"])
    return [x_nchw, out1, out2]


if __name__ == "__main__":
    key = jax.random.PRNGKey(0)
    k_x, k_p = jax.random.split(key)

    in_channel = 32
    B, H, W = 2, 16, 16
    x = jax.random.normal(k_x, (B, in_channel, H, W), jnp.float32)  # NCHW
    params = init_params(k_p, in_channel)

    fwd = jax.jit(feature_pyramid_forward)
    outs = fwd(x, params)
    outs = [jax.block_until_ready(o) for o in outs]

    # shape check: [x, out1, out2] with stride-2 downsampling at each stage
    assert outs[0].shape == (B, in_channel, H, W)
    assert outs[1].shape == (B, in_channel * 2, H // 2, W // 2)
    assert outs[2].shape == (B, in_channel * 4, H // 4, W // 4)

    refs = reference_forward(x, params)
    for o, r in zip(outs, refs):
        # bf16 MXU inputs with f32 accumulation on both paths -> ~1e-2 agreement
        np.testing.assert_allclose(np.asarray(o), np.asarray(r), rtol=1e-2, atol=1e-2)

    print("KERNEL_OK")
</pallas_src>

<mosaic_0001>
module attributes {stable_mosaic.version = 11 : i64} {
  func.func @_stage_kernel(%arg0: i32, %arg1: i32, %arg2: memref<1x8x2x9x64xbf16, #tpu.memory_space<vmem>>, %arg3: memref<1x1x2x9x64xbf16, #tpu.memory_space<vmem>>, %arg4: memref<9x32x64xbf16, #tpu.memory_space<vmem>>, %arg5: memref<1x64xf32, #tpu.memory_space<vmem>>, %arg6: memref<64x64xbf16, #tpu.memory_space<vmem>>, %arg7: memref<1x64xf32, #tpu.memory_space<vmem>>, %arg8: memref<1x8x8x64xf32, #tpu.memory_space<vmem>>) attributes {dimension_semantics = [#tpu.dimension_semantics<parallel>, #tpu.dimension_semantics<parallel>], iteration_bounds = array<i64: 2, 1>, scalar_prefetch = 0 : i64, scratch_operands = 0 : i64, tpu.core_type = #tpu.core_type<tc>, window_params = [{transform_indices = @transform_0, window_bounds = array<i64: 1, 8, 2, 9, 64>}, {transform_indices = @transform_1, window_bounds = array<i64: 1, 1, 2, 9, 64>}, {pipeline_mode = #tpu.pipeline_mode<synchronous>, transform_indices = @transform_2, window_bounds = array<i64: 9, 32, 64>}, {pipeline_mode = #tpu.pipeline_mode<synchronous>, transform_indices = @transform_3, window_bounds = array<i64: 1, 64>}, {pipeline_mode = #tpu.pipeline_mode<synchronous>, transform_indices = @transform_4, window_bounds = array<i64: 64, 64>}, {pipeline_mode = #tpu.pipeline_mode<synchronous>, transform_indices = @transform_5, window_bounds = array<i64: 1, 64>}, {transform_indices = @transform_6, window_bounds = array<i64: 1, 8, 8, 64>}]} {
    %c0 = arith.constant 0 : index
    %c0_0 = arith.constant 0 : index
    %c0_1 = arith.constant 0 : index
    %c0_2 = arith.constant 0 : index
    %c0_3 = arith.constant 0 : index
    %0 = vector.load %arg2[%c0, %c0_0, %c0_1, %c0_2, %c0_3] : memref<1x8x2x9x64xbf16, #tpu.memory_space<vmem>>, vector<1x8x2x9x64xbf16>
    %1 = vector.shape_cast %0 : vector<1x8x2x9x64xbf16> to vector<8x2x9x64xbf16>
    %c0_4 = arith.constant 0 : index
    %c0_5 = arith.constant 0 : index
    %c0_6 = arith.constant 0 : index
    %c0_7 = arith.constant 0 : index
    %c0_8 = arith.constant 0 : index
    %2 = vector.load %arg3[%c0_4, %c0_5, %c0_6, %c0_7, %c0_8] : memref<1x1x2x9x64xbf16, #tpu.memory_space<vmem>>, vector<1x1x2x9x64xbf16>
    %3 = vector.shape_cast %2 : vector<1x1x2x9x64xbf16> to vector<1x2x9x64xbf16>
    %4 = vector.extract_strided_slice %1 {offsets = [0, 0, 0, 0], sizes = [8, 1, 9, 64], strides = [1, 1, 1, 1]} : vector<8x2x9x64xbf16> to vector<8x1x9x64xbf16>
    %5 = vector.shape_cast %4 : vector<8x1x9x64xbf16> to vector<8x9x64xbf16>
    %6 = vector.extract_strided_slice %1 {offsets = [0, 1, 0, 0], sizes = [8, 1, 9, 64], strides = [1, 1, 1, 1]} : vector<8x2x9x64xbf16> to vector<8x1x9x64xbf16>
    %7 = vector.shape_cast %6 : vector<8x1x9x64xbf16> to vector<8x9x64xbf16>
    %8 = vector.extract_strided_slice %1 {offsets = [1, 0, 0, 0], sizes = [7, 1, 9, 64], strides = [1, 1, 1, 1]} : vector<8x2x9x64xbf16> to vector<7x1x9x64xbf16>
    %9 = vector.shape_cast %8 : vector<7x1x9x64xbf16> to vector<7x9x64xbf16>
    %10 = vector.extract_strided_slice %3 {offsets = [0, 0, 0, 0], sizes = [1, 1, 9, 64], strides = [1, 1, 1, 1]} : vector<1x2x9x64xbf16> to vector<1x1x9x64xbf16>
    %11 = vector.shape_cast %10 : vector<1x1x9x64xbf16> to vector<1x9x64xbf16>
    %12 = tpu.concatenate %9, %11 in 0 : vector<7x9x64xbf16>, vector<1x9x64xbf16> -> vector<8x9x64xbf16>
    %cst = arith.constant 0.000000e+00 : f32
    %13 = vector.broadcast %cst : f32 to vector<64x64xf32>
    %14 = vector.extract_strided_slice %5 {offsets = [0, 0, 0], sizes = [8, 8, 32], strides = [1, 1, 1]} : vector<8x9x64xbf16> to vector<8x8x32xbf16>
    %15 = vector.shape_cast %14 : vector<8x8x32xbf16> to vector<64x32xbf16>
    %c0_9 = arith.constant 0 : index
    %c0_10 = arith.constant 0 : index
    %c0_11 = arith.constant 0 : index
    %16 = vector.load %arg4[%c0_9, %c0_10, %c0_11] : memref<9x32x64xbf16, #tpu.memory_space<vmem>>, vector<1x32x64xbf16>
    %17 = vector.shape_cast %16 : vector<1x32x64xbf16> to vector<32x64xbf16>
    %cst_12 = arith.constant dense<0.000000e+00> : vector<64x64xf32>
    %18 = tpu.matmul %15, %17, %cst_12 {dimension_numbers = #tpu.dot_dimension_numbers<[1], [0], [0], [1], [0, 0, 1, 1], [], []>} : vector<64x32xbf16>, vector<32x64xbf16>, vector<64x64xf32> -> vector<64x64xf32>
    %19 = arith.addf %13, %18 : vector<64x64xf32>
    %20 = vector.extract_strided_slice %5 {offsets = [0, 0, 32], sizes = [8, 8, 32], strides = [1, 1, 1]} : vector<8x9x64xbf16> to vector<8x8x32xbf16>
    %21 = vector.shape_cast %20 : vector<8x8x32xbf16> to vector<64x32xbf16>
    %c1 = arith.constant 1 : index
    %c0_13 = arith.constant 0 : index
    %c0_14 = arith.constant 0 : index
    %22 = vector.load %arg4[%c1, %c0_13, %c0_14] : memref<9x32x64xbf16, #tpu.memory_space<vmem>>, vector<1x32x64xbf16>
    %23 = vector.shape_cast %22 : vector<1x32x64xbf16> to vector<32x64xbf16>
    %cst_15 = arith.constant dense<0.000000e+00> : vector<64x64xf32>
    %24 = tpu.matmul %21, %23, %cst_15 {dimension_numbers = #tpu.dot_dimension_numbers<[1], [0], [0], [1], [0, 0, 1, 1], [], []>} : vector<64x32xbf16>, vector<32x64xbf16>, vector<64x64xf32> -> vector<64x64xf32>
    %25 = arith.addf %19, %24 : vector<64x64xf32>
    %26 = vector.extract_strided_slice %5 {offsets = [0, 1, 0], sizes = [8, 8, 32], strides = [1, 1, 1]} : vector<8x9x64xbf16> to vector<8x8x32xbf16>
    %27 = vector.shape_cast %26 : vector<8x8x32xbf16> to vector<64x32xbf16>
    %c2 = arith.constant 2 : index
    %c0_16 = arith.constant 0 : index
    %c0_17 = arith.constant 0 : index
    %28 = vector.load %arg4[%c2, %c0_16, %c0_17] : memref<9x32x64xbf16, #tpu.memory_space<vmem>>, vector<1x32x64xbf16>
    %29 = vector.shape_cast %28 : vector<1x32x64xbf16> to vector<32x64xbf16>
    %cst_18 = arith.constant dense<0.000000e+00> : vector<64x64xf32>
    %30 = tpu.matmul %27, %29, %cst_18 {dimension_numbers = #tpu.dot_dimension_numbers<[1], [0], [0], [1], [0, 0, 1, 1], [], []>} : vector<64x32xbf16>, vector<32x64xbf16>, vector<64x64xf32> -> vector<64x64xf32>
    %31 = arith.addf %25, %30 : vector<64x64xf32>
    %32 = vector.extract_strided_slice %7 {offsets = [0, 0, 0], sizes = [8, 8, 32], strides = [1, 1, 1]} : vector<8x9x64xbf16> to vector<8x8x32xbf16>
    %33 = vector.shape_cast %32 : vector<8x8x32xbf16> to vector<64x32xbf16>
    %c3 = arith.constant 3 : index
    %c0_19 = arith.constant 0 : index
    %c0_20 = arith.constant 0 : index
    %34 = vector.load %arg4[%c3, %c0_19, %c0_20] : memref<9x32x64xbf16, #tpu.memory_space<vmem>>, vector<1x32x64xbf16>
    %35 = vector.shape_cast %34 : vector<1x32x64xbf16> to vector<32x64xbf16>
    %cst_21 = arith.constant dense<0.000000e+00> : vector<64x64xf32>
    %36 = tpu.matmul %33, %35, %cst_21 {dimension_numbers = #tpu.dot_dimension_numbers<[1], [0], [0], [1], [0, 0, 1, 1], [], []>} : vector<64x32xbf16>, vector<32x64xbf16>, vector<64x64xf32> -> vector<64x64xf32>
    %37 = arith.addf %31, %36 : vector<64x64xf32>
    %38 = vector.extract_strided_slice %7 {offsets = [0, 0, 32], sizes = [8, 8, 32], strides = [1, 1, 1]} : vector<8x9x64xbf16> to vector<8x8x32xbf16>
    %39 = vector.shape_cast %38 : vector<8x8x32xbf16> to vector<64x32xbf16>
    %c4 = arith.constant 4 : index
    %c0_22 = arith.constant 0 : index
    %c0_23 = arith.constant 0 : index
    %40 = vector.load %arg4[%c4, %c0_22, %c0_23] : memref<9x32x64xbf16, #tpu.memory_space<vmem>>, vector<1x32x64xbf16>
    %41 = vector.shape_cast %40 : vector<1x32x64xbf16> to vector<32x64xbf16>
    %cst_24 = arith.constant dense<0.000000e+00> : vector<64x64xf32>
    %42 = tpu.matmul %39, %41, %cst_24 {dimension_numbers = #tpu.dot_dimension_numbers<[1], [0], [0], [1], [0, 0, 1, 1], [], []>} : vector<64x32xbf16>, vector<32x64xbf16>, vector<64x64xf32> -> vector<64x64xf32>
    %43 = arith.addf %37, %42 : vector<64x64xf32>
    %44 = vector.extract_strided_slice %7 {offsets = [0, 1, 0], sizes = [8, 8, 32], strides = [1, 1, 1]} : vector<8x9x64xbf16> to vector<8x8x32xbf16>
    %45 = vector.shape_cast %44 : vector<8x8x32xbf16> to vector<64x32xbf16>
    %c5 = arith.constant 5 : index
    %c0_25 = arith.constant 0 : index
    %c0_26 = arith.constant 0 : index
    %46 = vector.load %arg4[%c5, %c0_25, %c0_26] : memref<9x32x64xbf16, #tpu.memory_space<vmem>>, vector<1x32x64xbf16>
    %47 = vector.shape_cast %46 : vector<1x32x64xbf16> to vector<32x64xbf16>
    %cst_27 = arith.constant dense<0.000000e+00> : vector<64x64xf32>
    %48 = tpu.matmul %45, %47, %cst_27 {dimension_numbers = #tpu.dot_dimension_numbers<[1], [0], [0], [1], [0, 0, 1, 1], [], []>} : vector<64x32xbf16>, vector<32x64xbf16>, vector<64x64xf32> -> vector<64x64xf32>
    %49 = arith.addf %43, %48 : vector<64x64xf32>
    %50 = vector.extract_strided_slice %12 {offsets = [0, 0, 0], sizes = [8, 8, 32], strides = [1, 1, 1]} : vector<8x9x64xbf16> to vector<8x8x32xbf16>
    %51 = vector.shape_cast %50 : vector<8x8x32xbf16> to vector<64x32xbf16>
    %c6 = arith.constant 6 : index
    %c0_28 = arith.constant 0 : index
    %c0_29 = arith.constant 0 : index
    %52 = vector.load %arg4[%c6, %c0_28, %c0_29] : memref<9x32x64xbf16, #tpu.memory_space<vmem>>, vector<1x32x64xbf16>
    %53 = vector.shape_cast %52 : vector<1x32x64xbf16> to vector<32x64xbf16>
    %cst_30 = arith.constant dense<0.000000e+00> : vector<64x64xf32>
    %54 = tpu.matmul %51, %53, %cst_30 {dimension_numbers = #tpu.dot_dimension_numbers<[1], [0], [0], [1], [0, 0, 1, 1], [], []>} : vector<64x32xbf16>, vector<32x64xbf16>, vector<64x64xf32> -> vector<64x64xf32>
    %55 = arith.addf %49, %54 : vector<64x64xf32>
    %56 = vector.extract_strided_slice %12 {offsets = [0, 0, 32], sizes = [8, 8, 32], strides = [1, 1, 1]} : vector<8x9x64xbf16> to vector<8x8x32xbf16>
    %57 = vector.shape_cast %56 : vector<8x8x32xbf16> to vector<64x32xbf16>
    %c7 = arith.constant 7 : index
    %c0_31 = arith.constant 0 : index
    %c0_32 = arith.constant 0 : index
    %58 = vector.load %arg4[%c7, %c0_31, %c0_32] : memref<9x32x64xbf16, #tpu.memory_space<vmem>>, vector<1x32x64xbf16>
    %59 = vector.shape_cast %58 : vector<1x32x64xbf16> to vector<32x64xbf16>
    %cst_33 = arith.constant dense<0.000000e+00> : vector<64x64xf32>
    %60 = tpu.matmul %57, %59, %cst_33 {dimension_numbers = #tpu.dot_dimension_numbers<[1], [0], [0], [1], [0, 0, 1, 1], [], []>} : vector<64x32xbf16>, vector<32x64xbf16>, vector<64x64xf32> -> vector<64x64xf32>
    %61 = arith.addf %55, %60 : vector<64x64xf32>
    %62 = vector.extract_strided_slice %12 {offsets = [0, 1, 0], sizes = [8, 8, 32], strides = [1, 1, 1]} : vector<8x9x64xbf16> to vector<8x8x32xbf16>
    %63 = vector.shape_cast %62 : vector<8x8x32xbf16> to vector<64x32xbf16>
    %c8 = arith.constant 8 : index
    %c0_34 = arith.constant 0 : index
    %c0_35 = arith.constant 0 : index
    %64 = vector.load %arg4[%c8, %c0_34, %c0_35] : memref<9x32x64xbf16, #tpu.memory_space<vmem>>, vector<1x32x64xbf16>
    %65 = vector.shape_cast %64 : vector<1x32x64xbf16> to vector<32x64xbf16>
    %cst_36 = arith.constant dense<0.000000e+00> : vector<64x64xf32>
    %66 = tpu.matmul %63, %65, %cst_36 {dimension_numbers = #tpu.dot_dimension_numbers<[1], [0], [0], [1], [0, 0, 1, 1], [], []>} : vector<64x32xbf16>, vector<32x64xbf16>, vector<64x64xf32> -> vector<64x64xf32>
    %67 = arith.addf %61, %66 : vector<64x64xf32>
    %c0_37 = arith.constant 0 : index
    %c0_38 = arith.constant 0 : index
    %68 = vector.load %arg5[%c0_37, %c0_38] : memref<1x64xf32, #tpu.memory_space<vmem>>, vector<1x64xf32>
    %69 = vector.broadcast %68 : vector<1x64xf32> to vector<64x64xf32>
    %70 = arith.addf %67, %69 : vector<64x64xf32>
    %cst_39 = arith.constant 0.000000e+00 : f32
    %71 = vector.broadcast %cst_39 : f32 to vector<64x64xf32>
    %72 = arith.cmpf ogt, %70, %71 : vector<64x64xf32>
    %cst_40 = arith.constant 2.000000e-01 : f32
    %73 = vector.broadcast %cst_40 : f32 to vector<64x64xf32>
    %74 = arith.mulf %73, %70 : vector<64x64xf32>
    %75 = arith.select %72, %70, %74 : vector<64x64xi1>, vector<64x64xf32>
    %76 = arith.truncf %75 : vector<64x64xf32> to vector<64x64xbf16>
    %c0_41 = arith.constant 0 : index
    %c0_42 = arith.constant 0 : index
    %77 = vector.load %arg6[%c0_41, %c0_42] : memref<64x64xbf16, #tpu.memory_space<vmem>>, vector<64x64xbf16>
    %cst_43 = arith.constant dense<0.000000e+00> : vector<64x64xf32>
    %78 = tpu.matmul %76, %77, %cst_43 {dimension_numbers = #tpu.dot_dimension_numbers<[1], [0], [0], [1], [0, 0, 1, 1], [], []>} : vector<64x64xbf16>, vector<64x64xbf16>, vector<64x64xf32> -> vector<64x64xf32>
    %c0_44 = arith.constant 0 : index
    %c0_45 = arith.constant 0 : index
    %79 = vector.load %arg7[%c0_44, %c0_45] : memref<1x64xf32, #tpu.memory_space<vmem>>, vector<1x64xf32>
    %80 = vector.broadcast %79 : vector<1x64xf32> to vector<64x64xf32>
    %81 = arith.addf %78, %80 : vector<64x64xf32>
    %cst_46 = arith.constant 0.000000e+00 : f32
    %82 = vector.broadcast %cst_46 : f32 to vector<64x64xf32>
    %83 = arith.cmpf ogt, %81, %82 : vector<64x64xf32>
    %cst_47 = arith.constant 2.000000e-01 : f32
    %84 = vector.broadcast %cst_47 : f32 to vector<64x64xf32>
    %85 = arith.mulf %84, %81 : vector<64x64xf32>
    %86 = arith.select %83, %81, %85 : vector<64x64xi1>, vector<64x64xf32>
    %87 = vector.shape_cast %86 : vector<64x64xf32> to vector<1x8x8x64xf32>
    %c0_48 = arith.constant 0 : index
    %c0_49 = arith.constant 0 : index
    %c0_50 = arith.constant 0 : index
    %c0_51 = arith.constant 0 : index
    %88 = vector.load %arg8[%c0_48, %c0_49, %c0_50, %c0_51] : memref<1x8x8x64xf32, #tpu.memory_space<vmem>>, vector<1x8x8x64xf32>
    tpu.vector_store %arg8[%c0_48, %c0_49, %c0_50, %c0_51], %87 {strides = array<i32>} : memref<1x8x8x64xf32, #tpu.memory_space<vmem>>, vector<1x8x8x64xf32>,
    return
  }
  func.func @transform_0(%arg0: i32, %arg1: i32) -> (i32, i32, i32, i32, i32) {
    %c0_i32 = arith.constant 0 : i32
    %c0_i32_0 = arith.constant 0 : i32
    %c0_i32_1 = arith.constant 0 : i32
    %c0_i32_2 = arith.constant 0 : i32
    return %arg0, %arg1, %c0_i32, %c0_i32_0, %c0_i32_1 : i32, i32, i32, i32, i32
  }
  func.func @transform_1(%arg0: i32, %arg1: i32) -> (i32, i32, i32, i32, i32) {
    %c1_i32 = arith.constant 1 : i32
    %0 = arith.addi %arg1, %c1_i32 : i32
    %c8_i32 = arith.constant 8 : i32
    %1 = arith.muli %0, %c8_i32 : i32
    %c8_i32_0 = arith.constant 8 : i32
    %2 = arith.minsi %1, %c8_i32_0 : i32
    %c0_i32 = arith.constant 0 : i32
    %c0_i32_1 = arith.constant 0 : i32
    %c0_i32_2 = arith.constant 0 : i32
    %c0_i32_3 = arith.constant 0 : i32
    return %arg0, %2, %c0_i32, %c0_i32_1, %c0_i32_2 : i32, i32, i32, i32, i32
  }
  func.func @transform_2(%arg0: i32, %arg1: i32) -> (i32, i32, i32) {
    %c0_i32 = arith.constant 0 : i32
    %c0_i32_0 = arith.constant 0 : i32
    %c0_i32_1 = arith.constant 0 : i32
    %c0_i32_2 = arith.constant 0 : i32
    return %c0_i32, %c0_i32_0, %c0_i32_1 : i32, i32, i32
  }
  func.func @transform_3(%arg0: i32, %arg1: i32) -> (i32, i32) {
    %c0_i32 = arith.constant 0 : i32
    %c0_i32_0 = arith.constant 0 : i32
    %c0_i32_1 = arith.constant 0 : i32
    return %c0_i32, %c0_i32_0 : i32, i32
  }
  func.func @transform_4(%arg0: i32, %arg1: i32) -> (i32, i32) {
    %c0_i32 = arith.constant 0 : i32
    %c0_i32_0 = arith.constant 0 : i32
    %c0_i32_1 = arith.constant 0 : i32
    return %c0_i32, %c0_i32_0 : i32, i32
  }
  func.func @transform_5(%arg0: i32, %arg1: i32) -> (i32, i32) {
    %c0_i32 = arith.constant 0 : i32
    %c0_i32_0 = arith.constant 0 : i32
    %c0_i32_1 = arith.constant 0 : i32
    return %c0_i32, %c0_i32_0 : i32, i32
  }
  func.func @transform_6(%arg0: i32, %arg1: i32) -> (i32, i32, i32, i32) {
    %c0_i32 = arith.constant 0 : i32
    %c0_i32_0 = arith.constant 0 : i32
    %c0_i32_1 = arith.constant 0 : i32
    return %arg0, %arg1, %c0_i32, %c0_i32_0 : i32, i32, i32, i32
  }
}

module attributes {stable_mosaic.version = 11 : i64} {
  func.func @_stage_kernel(%arg0: i32, %arg1: i32, %arg2: memref<1x4x2x5x128xbf16, #tpu.memory_space<vmem>>, %arg3: memref<1x1x2x5x128xbf16, #tpu.memory_space<vmem>>, %arg4: memref<9x64x128xbf16, #tpu.memory_space<vmem>>, %arg5: memref<1x128xf32, #tpu.memory_space<vmem>>, %arg6: memref<128x128xbf16, #tpu.memory_space<vmem>>, %arg7: memref<1x128xf32, #tpu.memory_space<vmem>>, %arg8: memref<1x4x4x128xf32, #tpu.memory_space<vmem>>) attributes {dimension_semantics = [#tpu.dimension_semantics<parallel>, #tpu.dimension_semantics<parallel>], iteration_bounds = array<i64: 2, 1>, scalar_prefetch = 0 : i64, scratch_operands = 0 : i64, tpu.core_type = #tpu.core_type<tc>, window_params = [{transform_indices = @transform_0, window_bounds = array<i64: 1, 4, 2, 5, 128>}, {transform_indices = @transform_1, window_bounds = array<i64: 1, 1, 2, 5, 128>}, {pipeline_mode = #tpu.pipeline_mode<synchronous>, transform_indices = @transform_2, window_bounds = array<i64: 9, 64, 128>}, {pipeline_mode = #tpu.pipeline_mode<synchronous>, transform_indices = @transform_3, window_bounds = array<i64: 1, 128>}, {pipeline_mode = #tpu.pipeline_mode<synchronous>, transform_indices = @transform_4, window_bounds = array<i64: 128, 128>}, {pipeline_mode = #tpu.pipeline_mode<synchronous>, transform_indices = @transform_5, window_bounds = array<i64: 1, 128>}, {transform_indices = @transform_6, window_bounds = array<i64: 1, 4, 4, 128>}]} {
    %c0 = arith.constant 0 : index
    %c0_0 = arith.constant 0 : index
    %c0_1 = arith.constant 0 : index
    %c0_2 = arith.constant 0 : index
    %c0_3 = arith.constant 0 : index
    %0 = vector.load %arg2[%c0, %c0_0, %c0_1, %c0_2, %c0_3] : memref<1x4x2x5x128xbf16, #tpu.memory_space<vmem>>, vector<1x4x2x5x128xbf16>
    %1 = vector.shape_cast %0 : vector<1x4x2x5x128xbf16> to vector<4x2x5x128xbf16>
    %c0_4 = arith.constant 0 : index
    %c0_5 = arith.constant 0 : index
    %c0_6 = arith.constant 0 : index
    %c0_7 = arith.constant 0 : index
    %c0_8 = arith.constant 0 : index
    %2 = vector.load %arg3[%c0_4, %c0_5, %c0_6, %c0_7, %c0_8] : memref<1x1x2x5x128xbf16, #tpu.memory_space<vmem>>, vector<1x1x2x5x128xbf16>
    %3 = vector.shape_cast %2 : vector<1x1x2x5x128xbf16> to vector<1x2x5x128xbf16>
    %4 = vector.extract_strided_slice %1 {offsets = [0, 0, 0, 0], sizes = [4, 1, 5, 128], strides = [1, 1, 1, 1]} : vector<4x2x5x128xbf16> to vector<4x1x5x128xbf16>
    %5 = vector.shape_cast %4 : vector<4x1x5x128xbf16> to vector<4x5x128xbf16>
    %6 = vector.extract_strided_slice %1 {offsets = [0, 1, 0, 0], sizes = [4, 1, 5, 128], strides = [1, 1, 1, 1]} : vector<4x2x5x128xbf16> to vector<4x1x5x128xbf16>
    %7 = vector.shape_cast %6 : vector<4x1x5x128xbf16> to vector<4x5x128xbf16>
    %8 = vector.extract_strided_slice %1 {offsets = [1, 0, 0, 0], sizes = [3, 1, 5, 128], strides = [1, 1, 1, 1]} : vector<4x2x5x128xbf16> to vector<3x1x5x128xbf16>
    %9 = vector.shape_cast %8 : vector<3x1x5x128xbf16> to vector<3x5x128xbf16>
    %10 = vector.extract_strided_slice %3 {offsets = [0, 0, 0, 0], sizes = [1, 1, 5, 128], strides = [1, 1, 1, 1]} : vector<1x2x5x128xbf16> to vector<1x1x5x128xbf16>
    %11 = vector.shape_cast %10 : vector<1x1x5x128xbf16> to vector<1x5x128xbf16>
    %12 = tpu.concatenate %9, %11 in 0 : vector<3x5x128xbf16>, vector<1x5x128xbf16> -> vector<4x5x128xbf16>
    %cst = arith.constant 0.000000e+00 : f32
    %13 = vector.broadcast %cst : f32 to vector<16x128xf32>
    %14 = vector.extract_strided_slice %5 {offsets = [0, 0, 0], sizes = [4, 4, 64], strides = [1, 1, 1]} : vector<4x5x128xbf16> to vector<4x4x64xbf16>
    %15 = vector.shape_cast %14 : vector<4x4x64xbf16> to vector<16x64xbf16>
    %c0_9 = arith.constant 0 : index
    %c0_10 = arith.constant 0 : index
    %c0_11 = arith.constant 0 : index
    %16 = vector.load %arg4[%c0_9, %c0_10, %c0_11] : memref<9x64x128xbf16, #tpu.memory_space<vmem>>, vector<1x64x128xbf16>
    %17 = vector.shape_cast %16 : vector<1x64x128xbf16> to vector<64x128xbf16>
    %cst_12 = arith.constant dense<0.000000e+00> : vector<16x128xf32>
    %18 = tpu.matmul %15, %17, %cst_12 {dimension_numbers = #tpu.dot_dimension_numbers<[1], [0], [0], [1], [0, 0, 1, 1], [], []>} : vector<16x64xbf16>, vector<64x128xbf16>, vector<16x128xf32> -> vector<16x128xf32>
    %19 = arith.addf %13, %18 : vector<16x128xf32>
    %20 = vector.extract_strided_slice %5 {offsets = [0, 0, 64], sizes = [4, 4, 64], strides = [1, 1, 1]} : vector<4x5x128xbf16> to vector<4x4x64xbf16>
    %21 = vector.shape_cast %20 : vector<4x4x64xbf16> to vector<16x64xbf16>
    %c1 = arith.constant 1 : index
    %c0_13 = arith.constant 0 : index
    %c0_14 = arith.constant 0 : index
    %22 = vector.load %arg4[%c1, %c0_13, %c0_14] : memref<9x64x128xbf16, #tpu.memory_space<vmem>>, vector<1x64x128xbf16>
    %23 = vector.shape_cast %22 : vector<1x64x128xbf16> to vector<64x128xbf16>
    %cst_15 = arith.constant dense<0.000000e+00> : vector<16x128xf32>
    %24 = tpu.matmul %21, %23, %cst_15 {dimension_numbers = #tpu.dot_dimension_numbers<[1], [0], [0], [1], [0, 0, 1, 1], [], []>} : vector<16x64xbf16>, vector<64x128xbf16>, vector<16x128xf32> -> vector<16x128xf32>
    %25 = arith.addf %19, %24 : vector<16x128xf32>
    %26 = vector.extract_strided_slice %5 {offsets = [0, 1, 0], sizes = [4, 4, 64], strides = [1, 1, 1]} : vector<4x5x128xbf16> to vector<4x4x64xbf16>
    %27 = vector.shape_cast %26 : vector<4x4x64xbf16> to vector<16x64xbf16>
    %c2 = arith.constant 2 : index
    %c0_16 = arith.constant 0 : index
    %c0_17 = arith.constant 0 : index
    %28 = vector.load %arg4[%c2, %c0_16, %c0_17] : memref<9x64x128xbf16, #tpu.memory_space<vmem>>, vector<1x64x128xbf16>
    %29 = vector.shape_cast %28 : vector<1x64x128xbf16> to vector<64x128xbf16>
    %cst_18 = arith.constant dense<0.000000e+00> : vector<16x128xf32>
    %30 = tpu.matmul %27, %29, %cst_18 {dimension_numbers = #tpu.dot_dimension_numbers<[1], [0], [0], [1], [0, 0, 1, 1], [], []>} : vector<16x64xbf16>, vector<64x128xbf16>, vector<16x128xf32> -> vector<16x128xf32>
    %31 = arith.addf %25, %30 : vector<16x128xf32>
    %32 = vector.extract_strided_slice %7 {offsets = [0, 0, 0], sizes = [4, 4, 64], strides = [1, 1, 1]} : vector<4x5x128xbf16> to vector<4x4x64xbf16>
    %33 = vector.shape_cast %32 : vector<4x4x64xbf16> to vector<16x64xbf16>
    %c3 = arith.constant 3 : index
    %c0_19 = arith.constant 0 : index
    %c0_20 = arith.constant 0 : index
    %34 = vector.load %arg4[%c3, %c0_19, %c0_20] : memref<9x64x128xbf16, #tpu.memory_space<vmem>>, vector<1x64x128xbf16>
    %35 = vector.shape_cast %34 : vector<1x64x128xbf16> to vector<64x128xbf16>
    %cst_21 = arith.constant dense<0.000000e+00> : vector<16x128xf32>
    %36 = tpu.matmul %33, %35, %cst_21 {dimension_numbers = #tpu.dot_dimension_numbers<[1], [0], [0], [1], [0, 0, 1, 1], [], []>} : vector<16x64xbf16>, vector<64x128xbf16>, vector<16x128xf32> -> vector<16x128xf32>
    %37 = arith.addf %31, %36 : vector<16x128xf32>
    %38 = vector.extract_strided_slice %7 {offsets = [0, 0, 64], sizes = [4, 4, 64], strides = [1, 1, 1]} : vector<4x5x128xbf16> to vector<4x4x64xbf16>
    %39 = vector.shape_cast %38 : vector<4x4x64xbf16> to vector<16x64xbf16>
    %c4 = arith.constant 4 : index
    %c0_22 = arith.constant 0 : index
    %c0_23 = arith.constant 0 : index
    %40 = vector.load %arg4[%c4, %c0_22, %c0_23] : memref<9x64x128xbf16, #tpu.memory_space<vmem>>, vector<1x64x128xbf16>
    %41 = vector.shape_cast %40 : vector<1x64x128xbf16> to vector<64x128xbf16>
    %cst_24 = arith.constant dense<0.000000e+00> : vector<16x128xf32>
    %42 = tpu.matmul %39, %41, %cst_24 {dimension_numbers = #tpu.dot_dimension_numbers<[1], [0], [0], [1], [0, 0, 1, 1], [], []>} : vector<16x64xbf16>, vector<64x128xbf16>, vector<16x128xf32> -> vector<16x128xf32>
    %43 = arith.addf %37, %42 : vector<16x128xf32>
    %44 = vector.extract_strided_slice %7 {offsets = [0, 1, 0], sizes = [4, 4, 64], strides = [1, 1, 1]} : vector<4x5x128xbf16> to vector<4x4x64xbf16>
    %45 = vector.shape_cast %44 : vector<4x4x64xbf16> to vector<16x64xbf16>
    %c5 = arith.constant 5 : index
    %c0_25 = arith.constant 0 : index
    %c0_26 = arith.constant 0 : index
    %46 = vector.load %arg4[%c5, %c0_25, %c0_26] : memref<9x64x128xbf16, #tpu.memory_space<vmem>>, vector<1x64x128xbf16>
    %47 = vector.shape_cast %46 : vector<1x64x128xbf16> to vector<64x128xbf16>
    %cst_27 = arith.constant dense<0.000000e+00> : vector<16x128xf32>
    %48 = tpu.matmul %45, %47, %cst_27 {dimension_numbers = #tpu.dot_dimension_numbers<[1], [0], [0], [1], [0, 0, 1, 1], [], []>} : vector<16x64xbf16>, vector<64x128xbf16>, vector<16x128xf32> -> vector<16x128xf32>
    %49 = arith.addf %43, %48 : vector<16x128xf32>
    %50 = vector.extract_strided_slice %12 {offsets = [0, 0, 0], sizes = [4, 4, 64], strides = [1, 1, 1]} : vector<4x5x128xbf16> to vector<4x4x64xbf16>
    %51 = vector.shape_cast %50 : vector<4x4x64xbf16> to vector<16x64xbf16>
    %c6 = arith.constant 6 : index
    %c0_28 = arith.constant 0 : index
    %c0_29 = arith.constant 0 : index
    %52 = vector.load %arg4[%c6, %c0_28, %c0_29] : memref<9x64x128xbf16, #tpu.memory_space<vmem>>, vector<1x64x128xbf16>
    %53 = vector.shape_cast %52 : vector<1x64x128xbf16> to vector<64x128xbf16>
    %cst_30 = arith.constant dense<0.000000e+00> : vector<16x128xf32>
    %54 = tpu.matmul %51, %53, %cst_30 {dimension_numbers = #tpu.dot_dimension_numbers<[1], [0], [0], [1], [0, 0, 1, 1], [], []>} : vector<16x64xbf16>, vector<64x128xbf16>, vector<16x128xf32> -> vector<16x128xf32>
    %55 = arith.addf %49, %54 : vector<16x128xf32>
    %56 = vector.extract_strided_slice %12 {offsets = [0, 0, 64], sizes = [4, 4, 64], strides = [1, 1, 1]} : vector<4x5x128xbf16> to vector<4x4x64xbf16>
    %57 = vector.shape_cast %56 : vector<4x4x64xbf16> to vector<16x64xbf16>
    %c7 = arith.constant 7 : index
    %c0_31 = arith.constant 0 : index
    %c0_32 = arith.constant 0 : index
    %58 = vector.load %arg4[%c7, %c0_31, %c0_32] : memref<9x64x128xbf16, #tpu.memory_space<vmem>>, vector<1x64x128xbf16>
    %59 = vector.shape_cast %58 : vector<1x64x128xbf16> to vector<64x128xbf16>
    %cst_33 = arith.constant dense<0.000000e+00> : vector<16x128xf32>
    %60 = tpu.matmul %57, %59, %cst_33 {dimension_numbers = #tpu.dot_dimension_numbers<[1], [0], [0], [1], [0, 0, 1, 1], [], []>} : vector<16x64xbf16>, vector<64x128xbf16>, vector<16x128xf32> -> vector<16x128xf32>
    %61 = arith.addf %55, %60 : vector<16x128xf32>
    %62 = vector.extract_strided_slice %12 {offsets = [0, 1, 0], sizes = [4, 4, 64], strides = [1, 1, 1]} : vector<4x5x128xbf16> to vector<4x4x64xbf16>
    %63 = vector.shape_cast %62 : vector<4x4x64xbf16> to vector<16x64xbf16>
    %c8 = arith.constant 8 : index
    %c0_34 = arith.constant 0 : index
    %c0_35 = arith.constant 0 : index
    %64 = vector.load %arg4[%c8, %c0_34, %c0_35] : memref<9x64x128xbf16, #tpu.memory_space<vmem>>, vector<1x64x128xbf16>
    %65 = vector.shape_cast %64 : vector<1x64x128xbf16> to vector<64x128xbf16>
    %cst_36 = arith.constant dense<0.000000e+00> : vector<16x128xf32>
    %66 = tpu.matmul %63, %65, %cst_36 {dimension_numbers = #tpu.dot_dimension_numbers<[1], [0], [0], [1], [0, 0, 1, 1], [], []>} : vector<16x64xbf16>, vector<64x128xbf16>, vector<16x128xf32> -> vector<16x128xf32>
    %67 = arith.addf %61, %66 : vector<16x128xf32>
    %c0_37 = arith.constant 0 : index
    %c0_38 = arith.constant 0 : index
    %68 = vector.load %arg5[%c0_37, %c0_38] : memref<1x128xf32, #tpu.memory_space<vmem>>, vector<1x128xf32>
    %69 = vector.broadcast %68 : vector<1x128xf32> to vector<16x128xf32>
    %70 = arith.addf %67, %69 : vector<16x128xf32>
    %cst_39 = arith.constant 0.000000e+00 : f32
    %71 = vector.broadcast %cst_39 : f32 to vector<16x128xf32>
    %72 = arith.cmpf ogt, %70, %71 : vector<16x128xf32>
    %cst_40 = arith.constant 2.000000e-01 : f32
    %73 = vector.broadcast %cst_40 : f32 to vector<16x128xf32>
    %74 = arith.mulf %73, %70 : vector<16x128xf32>
    %75 = arith.select %72, %70, %74 : vector<16x128xi1>, vector<16x128xf32>
    %76 = arith.truncf %75 : vector<16x128xf32> to vector<16x128xbf16>
    %c0_41 = arith.constant 0 : index
    %c0_42 = arith.constant 0 : index
    %77 = vector.load %arg6[%c0_41, %c0_42] : memref<128x128xbf16, #tpu.memory_space<vmem>>, vector<128x128xbf16>
    %cst_43 = arith.constant dense<0.000000e+00> : vector<16x128xf32>
    %78 = tpu.matmul %76, %77, %cst_43 {dimension_numbers = #tpu.dot_dimension_numbers<[1], [0], [0], [1], [0, 0, 1, 1], [], []>} : vector<16x128xbf16>, vector<128x128xbf16>, vector<16x128xf32> -> vector<16x128xf32>
    %c0_44 = arith.constant 0 : index
    %c0_45 = arith.constant 0 : index
    %79 = vector.load %arg7[%c0_44, %c0_45] : memref<1x128xf32, #tpu.memory_space<vmem>>, vector<1x128xf32>
    %80 = vector.broadcast %79 : vector<1x128xf32> to vector<16x128xf32>
    %81 = arith.addf %78, %80 : vector<16x128xf32>
    %cst_46 = arith.constant 0.000000e+00 : f32
    %82 = vector.broadcast %cst_46 : f32 to vector<16x128xf32>
    %83 = arith.cmpf ogt, %81, %82 : vector<16x128xf32>
    %cst_47 = arith.constant 2.000000e-01 : f32
    %84 = vector.broadcast %cst_47 : f32 to vector<16x128xf32>
    %85 = arith.mulf %84, %81 : vector<16x128xf32>
    %86 = arith.select %83, %81, %85 : vector<16x128xi1>, vector<16x128xf32>
    %87 = vector.shape_cast %86 : vector<16x128xf32> to vector<1x4x4x128xf32>
    %c0_48 = arith.constant 0 : index
    %c0_49 = arith.constant 0 : index
    %c0_50 = arith.constant 0 : index
    %c0_51 = arith.constant 0 : index
    %88 = vector.load %arg8[%c0_48, %c0_49, %c0_50, %c0_51] : memref<1x4x4x128xf32, #tpu.memory_space<vmem>>, vector<1x4x4x128xf32>
    tpu.vector_store %arg8[%c0_48, %c0_49, %c0_50, %c0_51], %87 {strides = array<i32>} : memref<1x4x4x128xf32, #tpu.memory_space<vmem>>, vector<1x4x4x128xf32>,
    return
  }
  func.func @transform_0(%arg0: i32, %arg1: i32) -> (i32, i32, i32, i32, i32) {
    %c0_i32 = arith.constant 0 : i32
    %c0_i32_0 = arith.constant 0 : i32
    %c0_i32_1 = arith.constant 0 : i32
    %c0_i32_2 = arith.constant 0 : i32
    return %arg0, %arg1, %c0_i32, %c0_i32_0, %c0_i32_1 : i32, i32, i32, i32, i32
  }
  func.func @transform_1(%arg0: i32, %arg1: i32) -> (i32, i32, i32, i32, i32) {
    %c1_i32 = arith.constant 1 : i32
    %0 = arith.addi %arg1, %c1_i32 : i32
    %c4_i32 = arith.constant 4 : i32
    %1 = arith.muli %0, %c4_i32 : i32
    %c4_i32_0 = arith.constant 4 : i32
    %2 = arith.minsi %1, %c4_i32_0 : i32
    %c0_i32 = arith.constant 0 : i32
    %c0_i32_1 = arith.constant 0 : i32
    %c0_i32_2 = arith.constant 0 : i32
    %c0_i32_3 = arith.constant 0 : i32
    return %arg0, %2, %c0_i32, %c0_i32_1, %c0_i32_2 : i32, i32, i32, i32, i32
  }
  func.func @transform_2(%arg0: i32, %arg1: i32) -> (i32, i32, i32) {
    %c0_i32 = arith.constant 0 : i32
    %c0_i32_0 = arith.constant 0 : i32
    %c0_i32_1 = arith.constant 0 : i32
    %c0_i32_2 = arith.constant 0 : i32
    return %c0_i32, %c0_i32_0, %c0_i32_1 : i32, i32, i32
  }
  func.func @transform_3(%arg0: i32, %arg1: i32) -> (i32, i32) {
    %c0_i32 = arith.constant 0 : i32
    %c0_i32_0 = arith.constant 0 : i32
    %c0_i32_1 = arith.constant 0 : i32
    return %c0_i32, %c0_i32_0 : i32, i32
  }
  func.func @transform_4(%arg0: i32, %arg1: i32) -> (i32, i32) {
    %c0_i32 = arith.constant 0 : i32
    %c0_i32_0 = arith.constant 0 : i32
    %c0_i32_1 = arith.constant 0 : i32
    return %c0_i32, %c0_i32_0 : i32, i32
  }
  func.func @transform_5(%arg0: i32, %arg1: i32) -> (i32, i32) {
    %c0_i32 = arith.constant 0 : i32
    %c0_i32_0 = arith.constant 0 : i32
    %c0_i32_1 = arith.constant 0 : i32
    return %c0_i32, %c0_i32_0 : i32, i32
  }
  func.func @transform_6(%arg0: i32, %arg1: i32) -> (i32, i32, i32, i32) {
    %c0_i32 = arith.constant 0 : i32
    %c0_i32_0 = arith.constant 0 : i32
    %c0_i32_1 = arith.constant 0 : i32
    return %arg0, %arg1, %c0_i32, %c0_i32_0 : i32, i32, i32, i32
  }
}

</mosaic_0001>

<bundles_post_ra>
// kernel: feature_pyramid_forward.2
= control target key start
LH: loop header
LB: loop body
LE: loop exit
PB: predicated region body
PF: predicated region fallthrough
CT: control target
= control target key end

     0   :  { %s2471_s21 = smov 0   ;;  %s2473_s22 = smov 0   ;;  %s2917_s0 = inlined_call_operand.vmem [shape: bf16[2,9,2,9,64], index: 0, kind: input, shape index: {}, may-alias: {0,1}]   ;;  %s2918_s1 = inlined_call_operand.vmem [shape: bf16[2,9,2,9,64], index: 1, kind: input, shape index: {}, may-alias: {0,1}]   ;;  %s2919_s2 = inlined_call_operand.vmem [shape: bf16[9,32,64], index: 2, kind: input, shape index: {}]   ;;  %s2920_s3 = inlined_call_operand.vmem [shape: f32[1,64], index: 3, kind: input, shape index: {}]   ;;  %s2921_s4 = inlined_call_operand.vmem [shape: bf16[64,64], index: 4, kind: input, shape index: {}]   ;;  %s2922_s5 = inlined_call_operand.vmem [shape: f32[1,64], index: 5, kind: input, shape index: {}]   ;;  %s2923_s6 = inlined_call_operand.vmem [shape: f32[2,8,8,64], index: 6, kind: output, shape index: {}]  }
   0x1   :  { %s2475_s23 = smov 0  }
   0x2 LB: > { %s28_s24 = sadd.s32 1, %s2429_s22  ;;  %p1970_p0 = scmp.ge.s32.totalorder %s2433_s23, 1  ;;  %s2433_s23 = sphi %s2475_s23, %s16_s23   ;;  %s2429_s22 = sphi %s2473_s22, %s2927_s22   ;;  %s2425_s21 = sphi %s2471_s21, %s2926_s21  }
   0x3   : > { %p30_p1 = scmp.ge.s32.totalorder %s28_s24, 2  ;;  %p278_p2 = scmp.lt.s32.totalorder %s2433_s23, 3 }
   0x5   : > { %s2929_s24 = smov (%p30_p1, %s28_s24), 0  ;;  %p279_p3 = pnand %p1970_p0, %p278_p2 }
   0x6   : > { %p343_p4 = scmp.lt.s32.totalorder (!%p279_p3), %s2425_s21, 1  ;;  %v2389_v0 = vld [vmem:[%s2919_s2 + $0x40] sm:$0xff] (!%p279_p3)   ;;  %v2390_v1 = vld [vmem:[%s2919_s2 + $0x48] sm:$0xff] (!%p279_p3)   ;;  %v2391_v2 = vld [vmem:[%s2919_s2 + $0x10] sm:$0xff] (!%p279_p3)   ;;  %vm637_vm0 = vsmask.f32 (!%p279_p3), 3328 }
   0x7   : > { %282 = sbr.rel (%p279_p3) target bundleno = 658 (0x292), region = 44  ;;  %2210 = vmatprep.subr.bf16.mxu0 (!%p279_p3), %v2389_v0  ;;  %v2504_v3 = vld [vmem:[%s2919_s2 + $0x50] sm:$0xff] (!%p279_p3)   ;;  %2162 = vmatprep.subr.bf16.mxu1 (!%p279_p3), %v2391_v2  ;;  %v2393_v4 = vld [vmem:[%s2919_s2 + $0x18] sm:$0xff] (!%p279_p3)   ;;  %vm638_vm1 = vsmask.f32 (!%p279_p3), 7440  ;;  %s2435_s15 = smov (!%p279_p3), 96  }
   0x8   : > { %2211 = vmatpush3.bf16.msra.mxu0 (!%p279_p3), %v2389_v0  ;;  %2163 = vmatpush3.bf16.msra.mxu1 (!%p279_p3), %v2391_v2  ;;  %vm2555_vm2 = vmor (!%p279_p3), %vm637_vm0, %vm638_vm1  ;;  %v2570_v2 = vld [vmem:[%s2919_s2] sm:$0xff] (!%p279_p3)   ;;  %vm470_vm3 = vcmask (!%p279_p3), 261120   ;;  %vm1745_vm8 = vcmask (!%p279_p3), 523264  }
   0x9   : > { %2212 = vmatprep.subr.bf16.mxu0 (!%p279_p3), %v2390_v1  ;;  %2164 = vmatprep.subr.bf16.mxu1 (!%p279_p3), %v2393_v4  ;;  %v2396_v57 = vld [vmem:[%s2919_s2 + $0x60] sm:$0xff] (!%p279_p3)  }
   0xc   : > { %2213 = vmatpush3.bf16.msra.mxu0 (!%p279_p3), %v2390_v1  ;;  %2165 = vmatpush3.bf16.msra.mxu1 (!%p279_p3), %v2393_v4 }
   0xd   : > { %2222 = vmatprep.subr.bf16.mxu0 (!%p279_p3), %v2504_v3  ;;  %2174 = vmatprep.subr.bf16.mxu1 (!%p279_p3), %v2570_v2 }
   0xe   : > { %s2931_s21 = smov (!%p343_p4, %s2425_s21), 1 }
   0xf   : > { %s2350_s29 = smul.u32 144, %s2931_s21 }
  0x11   : > { %s2511_s12 = scalar_lea.vmem %s2917_s0, %s2350_s29  ;;  %s2098_s18 = sadd.s32 128, %s2350_s29 }
  0x12   : > { %v389_v5 = vld [vmem:[%s2511_s12 + $0x8] sm:$0xf]  ;;  %v393_v6 = vld [vmem:[%s2511_s12 + $0x18] sm:$0xf]  ;;  %v398_v22 = vld [vmem:[%s2511_s12 + $0x2c] sm:$0x1]  ;;  %s2604_s25 = scalar_lea.vmem %s2918_s1, %s2098_s18 }
  0x13   : > { %v405_v7 = vld [vmem:[%s2511_s12 + $0x48] sm:$0xf]  ;;  %v2519_v8 = vcombine.low %v389_v5, %v393_v6  ;;  %v1099_v9 = vshrl.u32 %v389_v5, 16  ;;  %v1102_v10 = vshll.u32 %v389_v5, 16  ;;  %v1113_v11 = vshrl.u32 %v393_v6, 16  ;;  %s2099_s18 = sshll.u32 %s2931_s21, 6 }
  0x14   : > { %v409_v12 = vld [vmem:[%s2511_s12 + $0x58] sm:$0xf]  ;;  %v1116_v13 = vshll.u32 %v393_v6, 16  ;;  %v1155_v15 = vshrl.u32 %v405_v7, 16  ;;  %v1158_v16 = vshll.u32 %v405_v7, 16  ;;  %v1136_v39 = vshll.u32 %v398_v22, 16 }
  0x15   : > { %v2522_v14 = vcombine.low %v405_v7, %v409_v12  ;;  %v397_v17 = vld [vmem:[%s2511_s12 + $0x28] sm:$0xf]  ;;  %v1101_v18 = vrot.slane %v1099_v9, 4  ;;  %v1104_v19 = vrot.slane %v1102_v10, 5  ;;  %v1115_v20 = vrot.slane %v1113_v11, 4  ;;  %993 = vrot.lane.b32.xlu0 %v2519_v8, %s2435_s15 }
  0x16   : > { %v1169_v21 = vshrl.u32 %v409_v12, 16  ;;  %v1118_v23 = vrot.slane %v1116_v13, 5  ;;  %v1157_v24 = vrot.slane %v1155_v15, 4  ;;  %v1160_v25 = vrot.slane %v1158_v16, 5  ;;  %v401_v27 = vld [vmem:[%s2511_s12 + $0x38] sm:$0xf] }
  0x17   : > { %v1172_v26 = vshll.u32 %v409_v12, 16  ;;  %997 = vrot.lane.b32.xlu1 %v2522_v14, %s2435_s15  ;;  %v1105_v28 = vor.u32 %v1104_v19, %v1101_v18  ;;  %v2532_v30 = vcombine.low %v397_v17, %v401_v27  ;;  %v1127_v31 = vshrl.u32 %v397_v17, 16  ;;  %v402_v35 = vld [vmem:[%s2511_s12 + $0x3c] sm:$0x1]  ;;  %v413_v37 = vld [vmem:[%s2511_s12 + $0x68] sm:$0xf] }
  0x18   : > { %v1171_v29 = vrot.slane %v1169_v21, 4  ;;  %v1119_v32 = vor.u32 %v1118_v23, %v1115_v20  ;;  %v1161_v33 = vor.u32 %v1160_v25, %v1157_v24  ;;  %v1130_v36 = vshll.u32 %v397_v17, 16  ;;  %v417_v41 = vld [vmem:[%s2511_s12 + $0x78] sm:$0xf]  ;;  %v387_v46 = vld [vmem:[%s2511_s12] sm:$0xf] }
  0x19   : > { %v1174_v34 = vrot.slane %v1172_v26, 5  ;;  %v1129_v38 = vrot.slane %v1127_v31, 4  ;;  %v1141_v40 = vshrl.u32 %v401_v27, 16  ;;  %995 = vrot.lane.b32.xlu0 %v2532_v30, %s2435_s15  ;;  %v2539_v42 = vrot.slane %v1105_v28, 4  ;;  %v2547_v51 = vld [vmem:[%s2511_s12 + $0x10] sm:$0xf] }
  0x1a   : > { %v2541_v43 = vrot.slane %v1119_v32, 4  ;;  %v1132_v45 = vrot.slane %v1130_v36, 5  ;;  %v2544_v47 = vrot.slane %v1161_v33, 4  ;;  %v1144_v49 = vshll.u32 %v401_v27, 16  ;;  %v2565_v1 = vld [vmem:[%s2511_s12 + $0x20] sm:$0xf] }
  0x1b   : > { %v1175_v44 = vor.u32 %v1174_v34, %v1171_v29  ;;  %v1143_v48 = vrot.slane %v1141_v40, 4  ;;  %v1150_v50 = vshll.u32 %v402_v35, 16  ;;  %v1138_v53 = vrot.slane %v1136_v39, 5  ;;  %v399_v9 = vld [vmem:[%s2511_s12 + $0x30] sm:$0xf] }
  0x1c   : > { %v1133_v52 = vor.u32 %v1132_v45, %v1129_v38  ;;  %v2549_v54 = vcombine.low %v413_v37, %v417_v41  ;;  %v1183_v55 = vshrl.u32 %v413_v37, 16  ;;  %v1146_v58 = vrot.slane %v1144_v49, 5  ;;  %v403_v17 = vld [vmem:[%s2511_s12 + $0x40] sm:$0xf]  ;;  %v407_v21 = vld [vmem:[%s2511_s12 + $0x50] sm:$0xf] }
  0x1d   : > { %v2551_v56 = vrot.slane %v1175_v44, 4  ;;  %v1186_v59 = vshll.u32 %v413_v37, 16  ;;  %v1197_v60 = vshrl.u32 %v417_v41, 16  ;;  %v1152_v62 = vrot.slane %v1150_v50, 5  ;;  %v411_v26 = vld [vmem:[%s2511_s12 + $0x60] sm:$0xf] }
  0x1e   : > { %v1134_v61 = vrot.slane %v1133_v52, 4  ;;  %v1200_v63 = vshll.u32 %v417_v41, 16  ;;  %999 = vrot.lane.b32.xlu1 %v2549_v54, %s2435_s15  ;;  %v2562_v0 = vcombine.low %v387_v46, %v2547_v51  ;;  %v1147_v4 = vor.u32 %v1146_v58, %v1143_v48  ;;  %v2592_v27 = vld [vmem:[%s2511_s12 + $0x70] sm:$0xf] }
  0x1f   : > { %v1185_v5 = vrot.slane %v1183_v55, 4  ;;  %v1188_v6 = vrot.slane %v1186_v59, 5  ;;  %v641_v7 = vshrl.u32 %v387_v46, 16  ;;  %v1199_v11 = vrot.slane %v1197_v60, 4  ;;  %v390_v59 = vld [vmem:[%s2511_s12 + $0xc] sm:$0x1] }
  0x20   : > { %v1139_v10 = vsel %vm2555_vm2, %v1134_v61, %v1138_v53  ;;  %v1202_v12 = vrot.slane %v1200_v63, 5  ;;  %v644_v13 = vshll.u32 %v387_v46, 16  ;;  %450 = vrot.lane.b32.xlu0 %v2562_v0, %s2435_s15  ;;  %v1148_v15 = vrot.slane %v1147_v4, 4  ;;  %v2616_v53 = vld [vmem:[%s2604_s25] sm:$0xf] }
  0x21   : > { %v643_v16 = vrot.slane %v641_v7, 4  ;;  %v655_v19 = vshrl.u32 %v2547_v51, 16  ;;  %v2583_v20 = vcombine.low %v2565_v1, %v399_v9  ;;  %v1189_v23 = vor.u32 %v1188_v6, %v1185_v5  ;;  %v394_v60 = vld [vmem:[%s2511_s12 + $0x1c] sm:$0x1]  ;;  %v406_v5 = vld [vmem:[%s2511_s12 + $0x4c] sm:$0x1] }
  0x22   : > { %v646_v18 = vrot.slane %v644_v13, 5  ;;  %v1153_v22 = vsel %vm2555_vm2, %v1148_v15, %v1152_v62  ;;  %v658_v24 = vshll.u32 %v2547_v51, 16  ;;  %v669_v25 = vshrl.u32 %v2565_v1, 16 }
  0x23   : > { %v2594_v28 = vcombine.low %v1139_v10, %v1153_v22  ;;  %v1203_v29 = vor.u32 %v1202_v12, %v1199_v11  ;;  %v672_v32 = vshll.u32 %v2565_v1, 16  ;;  %452 = vrot.lane.b32.xlu1 %v2583_v20, %s2435_s15  ;;  %v683_v34 = vshrl.u32 %v399_v9, 16  ;;  %v410_v12 = vld [vmem:[%s2511_s12 + $0x5c] sm:$0x1] }
  0x24   : > { %v647_v31 = vor.u32 %v646_v18, %v643_v16  ;;  %v671_v33 = vrot.slane %v669_v25, 4  ;;  %v686_v35 = vshll.u32 %v399_v9, 16  ;;  %v2599_v36 = vcombine.low %v403_v17, %v407_v21  ;;  %v414_v16 = vld [vmem:[%s2511_s12 + $0x6c] sm:$0x1] }
  0x25   : > { %v2606_v37 = vrot.slane %v655_v19, 4  ;;  %v674_v38 = vrot.slane %v672_v32, 5  ;;  %v697_v39 = vshrl.u32 %v403_v17, 16  ;;  %v700_v40 = vshll.u32 %v403_v17, 16 }
  0x26   : > { %v2608_v41 = vrot.slane %v1189_v23, 4  ;;  %v685_v44 = vrot.slane %v683_v34, 4  ;;  %v688_v45 = vrot.slane %v686_v35, 5  ;;  %v711_v46 = vshrl.u32 %v407_v21, 16  ;;  %454 = vrot.lane.b32.xlu0 %v2599_v36, %s2435_s15 }
  0x27   : > { %v660_v48 = vrot.slane %v658_v24, 5  ;;  %v675_v49 = vor.u32 %v674_v38, %v671_v33  ;;  %v714_v50 = vshll.u32 %v407_v21, 16  ;;  %v2613_v52 = vcombine.low %v411_v26, %v2592_v27  ;;  %v388_v38 = vld [vmem:[%s2511_s12 + $0x4] sm:$0x1] }
  0x28   : > { %v2618_v55 = vrot.slane %v1203_v29, 4  ;;  %v2620_v58 = vrot.slane %v647_v31, 4  ;;  %v689_v61 = vor.u32 %v688_v45, %v685_v44  ;;  %v2624_v62 = vrot.slane %v697_v39, 4 }
  0x29   : > { %v2626_v63 = vrot.slane %v700_v40, 5  ;;  %v2628_v4 = vrot.slane %v711_v46, 4  ;;  %456 = vrot.lane.b32.xlu1 %v2613_v52, %s2435_s15  ;;  %v725_v6 = vshrl.u32 %v411_v26, 16  ;;  %v728_v7 = vshll.u32 %v411_v26, 16 }
  0x2a   : > { %v2635_v10 = vcombine.low %v2547_v51, %v2565_v1  ;;  %v2637_v11 = vcombine.low %v399_v9, %v403_v17  ;;  %v2640_v13 = vrot.slane %v675_v49, 4  ;;  %v2642_v15 = vrot.slane %v714_v50, 5  ;;  %v418_v1 = vld [vmem:[%s2511_s12 + $0x7c] sm:$0x1]  ;;  %v400_v49 = vld [vmem:[%s2511_s12 + $0x34] sm:$0x1] }
  0x2b   : > { %v739_v18 = vshrl.u32 %v2592_v27, 16  ;;  %v742_v19 = vshll.u32 %v2592_v27, 16  ;;  %v2649_v22 = vcombine.low %v407_v21, %v411_v26  ;;  %v2653_v51 = vcombine.low %v2592_v27, %v2616_v53 }
  0x2c   : > { %1437 = vrot.lane.b32.xlu0 %v2635_v10, %s2435_s15  ;;  %v1108_v9 = vshll.u32 %v390_v59, 16  ;;  %v1122_v17 = vshll.u32 %v394_v60, 16  ;;  %v1164_v23 = vshll.u32 %v406_v5, 16  ;;  %v1178_v24 = vshll.u32 %v410_v12, 16 }
  0x2d   : > { %1439 = vrot.lane.b32.xlu1 %v2637_v11, %s2435_s15  ;;  %v690_v25 = vrot.slane %v689_v61, 4  ;;  %v727_v29 = vrot.slane %v725_v6, 4  ;;  %v730_v31 = vrot.slane %v728_v7, 5  ;;  %v1192_v32 = vshll.u32 %v414_v16, 16 }
  0x2e   : > { %v1110_v21 = vrot.slane %v1108_v9, 5  ;;  %v1124_v26 = vrot.slane %v1122_v17, 5  ;;  %v1166_v27 = vrot.slane %v1164_v23, 5  ;;  %v1180_v33 = vrot.slane %v1178_v24, 5  ;;  %v408_v23 = vld [vmem:[%s2511_s12 + $0x54] sm:$0x1] }
  0x2f   : > { %v1194_v34 = vrot.slane %v1192_v32, 5  ;;  %v1206_v35 = vshll.u32 %v418_v1, 16  ;;  %v661_v39 = vor.u32 %v660_v48, %v2606_v37  ;;  %v392_v37 = vld [vmem:[%s2511_s12 + $0x14] sm:$0x1]  ;;  %v396_v48 = vld [vmem:[%s2511_s12 + $0x24] sm:$0x1]  ;;  %v703_v24 = vor.u32 %v2626_v63, %v2624_v62 }
  0x30   : > { %1441 = vrot.lane.b32.xlu0 %v2649_v22, %s2435_s15  ;;  %v1111_v40 = vsel %vm2555_vm2, %v2539_v42, %v1110_v21  ;;  %v1125_v44 = vsel %vm2555_vm2, %v2541_v43, %v1124_v26  ;;  %v1167_v45 = vsel %vm2555_vm2, %v2544_v47, %v1166_v27  ;;  %v1181_v46 = vsel %vm2555_vm2, %v2551_v56, %v1180_v33  ;;  %v404_v1 = vld [vmem:[%s2511_s12 + $0x44] sm:$0x1]  ;;  %v416_v27 = vld [vmem:[%s2511_s12 + $0x74] sm:$0x1] }
  0x31   : > { %1443 = vrot.lane.b32.xlu1 %v2653_v51, %s2435_s15  ;;  %v741_v50 = vrot.slane %v739_v18, 4  ;;  %v2679_v59 = vcombine.low %v1111_v40, %v1125_v44  ;;  %v2681_v42 = vcombine.low %v1167_v45, %v1181_v46  ;;  %v1195_v43 = vsel %vm2555_vm2, %v2608_v41, %v1194_v34  ;;  %v412_v32 = vld [vmem:[%s2511_s12 + $0x64] sm:$0x1] }
  0x32   : > { %v1208_v60 = vrot.slane %v1206_v35, 5  ;;  %v650_v47 = vshll.u32 %v388_v38, 16  ;;  %v662_v61 = vrot.slane %v661_v39, 4  ;;  %v664_v5 = vshll.u32 %v392_v37, 16 }
  0x33   : > { %v678_v56 = vshll.u32 %v396_v48, 16  ;;  %v692_v6 = vshll.u32 %v400_v49, 16  ;;  %v744_v7 = vrot.slane %v742_v19, 5  ;;  %v717_v26 = vor.u32 %v2642_v15, %v2628_v4 }
  0x34   : > { %v1209_v12 = vsel %vm2555_vm2, %v2618_v55, %v1208_v60  ;;  %v652_v16 = vrot.slane %v650_v47, 5  ;;  %v666_v18 = vrot.slane %v664_v5, 5  ;;  %v706_v55 = vshll.u32 %v404_v1, 16 }
  0x35   : > { %v2690_v9 = vcombine.low %v1195_v43, %v1209_v12  ;;  %v680_v17 = vrot.slane %v678_v56, 5  ;;  %v694_v41 = vrot.slane %v692_v6, 5  ;;  %v704_v63 = vrot.slane %v703_v24, 4  ;;  %v420_v6 = vld [vmem:[%s2604_s25 + $0x4] sm:$0x1]  ;;  %s2890_s25 = scalar_lea.vmem %s2923_s6, %s2099_s18 }
  0x36   : > { %v653_v19 = vsel %vm2555_vm2, %v2620_v58, %v652_v16  ;;  %v2701_v21 = vsel %vm2555_vm2, %v662_v61, %v666_v18  ;;  %v708_v35 = vrot.slane %v706_v55, 5  ;;  %v718_v38 = vrot.slane %v717_v26, 4 }
  0x37   : > { %v2707_v33 = vcombine.low %v653_v19, %v2701_v21  ;;  %v2712_v62 = vsel %vm2555_vm2, %v2640_v13, %v680_v17  ;;  %v2716_v58 = vsel %vm2555_vm2, %v690_v25, %v694_v41  ;;  %v720_v4 = vshll.u32 %v408_v23, 16 }
  0x38   : > { %v2000_v34 = vcombine.low %v2712_v62, %v2716_v58  ;;  %v731_v15 = vor.u32 %v730_v31, %v727_v29  ;;  %v734_v39 = vshll.u32 %v412_v32, 16  ;;  %v745_v40 = vor.u32 %v744_v7, %v741_v50  ;;  %v2394_v32 = vld [vmem:[%s2919_s2 + $0x58] sm:$0xff]  }
  0x39   : > { %v748_v44 = vshll.u32 %v416_v27, 16  ;;  %v2722_v45 = vsel %vm2555_vm2, %v704_v63, %v708_v35  ;;  %v722_v13 = vrot.slane %v720_v4, 5  ;;  %v1543_v31 = vshrl.u32 %v2616_v53, 16  ;;  %v2398_v35 = vld [vmem:[%s2919_s2 + $0x68] sm:$0xff]  }
  0x3a   : > { %v2076_v25 = vcombine.low %v2716_v58, %v2722_v45  ;;  %v732_v46 = vrot.slane %v731_v15, 4  ;;  %v736_v37 = vrot.slane %v734_v39, 5  ;;  %v746_v48 = vrot.slane %v745_v40, 4 }
  0x3b   : > { %v2728_v49 = vsel %vm2555_vm2, %v718_v38, %v722_v13  ;;  %v750_v29 = vrot.slane %v748_v44, 5  ;;  %v1546_v50 = vshll.u32 %v2616_v53, 16  ;;  %v1545_v5 = vrot.slane %v1543_v31, 4 }
  0x3c   : > { %v2001_v43 = vcombine.low %v2722_v45, %v2728_v49  ;;  %v2736_v60 = vsel %vm2555_vm2, %v732_v46, %v736_v37  ;;  %v1552_v12 = vshll.u32 %v420_v6, 16  ;;  %v2075_v18 = vcombine.low %v2701_v21, %v2712_v62 }
  0x3d   : > { %v2740_v47 = vsel %vm2555_vm2, %v746_v48, %v750_v29  ;;  %v1548_v56 = vrot.slane %v1546_v50, 5  ;;  %v2077_v1 = vcombine.low %v2728_v49, %v2736_v60 }
  0x3e   : > { %v2002_v61 = vcombine.low %v2736_v60, %v2740_v47  ;;  %v1554_v16 = vrot.slane %v1552_v12, 5 }
  0x3f   : > { %v1549_v7 = vor.u32 %v1548_v56, %v1545_v5 }
  0x41   : > { %v1550_v53 = vrot.slane %v1549_v7, 4 }
  0x43   : > { %v1555_v17 = vsel %vm2555_vm2, %v1550_v53, %v1554_v16 }
  0x44   : > { %v2752_v41 = vcombine.low %v2740_v47, %v1555_v17 }
  0x87   : > { %v994_v23 = vpop.permute.xlu0 %993 }
  0x88   : > { %2214 = vmatprep.mubr.msk.bf16.mxu0 %vm470_vm3, %v994_v23 }
  0x89   : > { %v998_v24 = vpop.permute.xlu1 %997 }
  0x8b   : > { %v996_v19 = vpop.permute.xlu0 %995 }
  0x8c   : > { %2215 = vmatmul.mubr.msk.bf16.vlgmr.msra.gmra.mrb[0].mxu0 %vm470_vm3, %v996_v19 }
  0x8d   : > { %2223 = vmatpush3.bf16.msra.mxu0 %v2504_v3  ;;  %2218 = vmatprep.mubr.msk.bf16.mxu0 %vm470_vm3, %v998_v24  ;;  %v2397_v3 = vld [vmem:[%s2919_s2 + $0x8] sm:$0xff]  }
  0x8e   : > { %2224 = vmatprep.subr.bf16.mxu0 %v2394_v32 }
  0x90   : > { %v1000_v55 = vpop.permute.xlu1 %999 }
  0x91   : > { %2225 = vmatpush3.bf16.msra.mxu0 %v2394_v32 }
  0x92   : > { %v451_v26 = vpop.permute.xlu0 %450  ;;  %2234 = vmatprep.subr.bf16.mxu0 %v2396_v57 }
  0x93   : > { %2166 = vmatprep.mubr.msk.bf16.mxu1 %vm470_vm3, %v451_v26 }
  0x94   : > { %2219 = vmatmul.mubr.msk.bf16.gmra.mrb[4].mxu0 %vm470_vm3, %v1000_v55 }
  0x95   : > { %2226 = vmatprep.mubr.msk.bf16.mxu0 %vm470_vm3, %v2679_v59  ;;  %v453_v27 = vpop.permute.xlu1 %452  ;;  %v2399_v59 = vld [vmem:[%s2919_s2 + $0x20] sm:$0xff]  }
  0x96   : > { %2167 = vmatmul.mubr.msk.bf16.vlgmr.msra.gmra.mrb[0].mxu1 %vm470_vm3, %v453_v27 }
  0x97   : > { %2175 = vmatpush3.bf16.msra.mxu1 %v2570_v2  ;;  %v2400_v2 = vld [vmem:[%s2919_s2 + $0x70] sm:$0xff]  }
  0x98   : > { %v455_v63 = vpop.permute.xlu0 %454  ;;  %2176 = vmatprep.subr.bf16.mxu1 %v2397_v3 }
  0x99   : > { %2170 = vmatprep.mubr.msk.bf16.mxu1 %vm470_vm3, %v455_v63 }
  0x9b   : > { %v457_v38 = vpop.permute.xlu1 %456  ;;  %2177 = vmatpush3.bf16.msra.mxu1 %v2397_v3 }
  0x9c   : > { %2227 = vmatmul.mubr.msk.bf16.vlgmr.msra.gmra.mrb[0].mxu0 %vm470_vm3, %v2594_v28  ;;  %2186 = vmatprep.subr.bf16.mxu1 %v2399_v59  ;;  %v2401_v28 = vld [vmem:[%s2919_s2 + $0x28] sm:$0xff]  }
  0x9d   : > { %2235 = vmatpush3.bf16.msra.mxu0 %v2396_v57  ;;  %2230 = vmatprep.mubr.msk.bf16.mxu0 %vm470_vm3, %v2681_v42 }
  0x9e   : > { %2236 = vmatprep.subr.bf16.mxu0 %v2398_v35  ;;  %2171 = vmatmul.mubr.msk.bf16.gmra.mrb[4].mxu1 %vm470_vm3, %v457_v38 }
  0x9f   : > { %2178 = vmatprep.mubr.msk.bf16.mxu1 %vm470_vm3, %v2562_v0  ;;  %v2402_v0 = vld [vmem:[%s2919_s2 + $0x78] sm:$0xff]  }
  0xa1   : > { %2237 = vmatpush3.bf16.msra.mxu0 %v2398_v35 }
  0xa2   : > { %2246 = vmatprep.subr.bf16.mxu0 %v2400_v2 }
  0xa4   : > { %2231 = vmatmul.mubr.msk.bf16.gmra.mrb[4].mxu0 %vm470_vm3, %v2690_v9 }
  0xa5   : > { %2238 = vmatprep.mubr.msk.bf16.mxu0 %vm470_vm3, %v2635_v10  ;;  %v2403_v10 = vld [vmem:[%s2919_s2 + $0x30] sm:$0xff]  }
  0xa6   : > { %2179 = vmatmul.mubr.msk.bf16.vlgmr.msra.gmra.mrb[0].mxu1 %vm470_vm3, %v2583_v20  ;;  %v2404_v20 = vld [vmem:[%s2919_s2 + $0x80] sm:$0xff]  }
  0xa7   : > { %2182 = vmatprep.mubr.msk.bf16.mxu1 %vm470_vm3, %v2599_v36  ;;  %2187 = vmatpush3.bf16.msra.mxu1 %v2399_v59  ;;  %v1438_v36 = vpop.permute.xlu0 %1437 }
  0xa8   : > { %2188 = vmatprep.subr.bf16.mxu1 %v2401_v28 }
  0xab   : > { %2189 = vmatpush3.bf16.msra.mxu1 %v2401_v28 }
  0xac   : > { %2239 = vmatmul.mubr.msk.bf16.vlgmr.msra.gmra.mrb[0].mxu0 %vm470_vm3, %v2637_v11  ;;  %2198 = vmatprep.subr.bf16.mxu1 %v2403_v10  ;;  %v2405_v11 = vld [vmem:[%s2919_s2 + $0x38] sm:$0xff]  }
  0xad   : > { %2247 = vmatpush3.bf16.msra.mxu0 %v2400_v2  ;;  %2242 = vmatprep.mubr.msk.bf16.mxu0 %vm470_vm3, %v2649_v22  ;;  %v1442_v22 = vpop.permute.xlu0 %1441 }
  0xae   : > { %2248 = vmatprep.subr.bf16.mxu0 %v2402_v0  ;;  %2183 = vmatmul.mubr.msk.bf16.gmra.mrb[4].mxu1 %vm470_vm3, %v2613_v52  ;;  %v1440_v52 = vpop.permute.xlu1 %1439 }
  0xaf   : > { %2190 = vmatprep.mubr.msk.bf16.mxu1 %vm470_vm3, %v2707_v33 }
  0xb1   : > { %2249 = vmatpush3.bf16.msra.mxu0 %v2402_v0 }
  0xb2   : > { %2258 = vmatprep.subr.bf16.mxu0 %v2404_v20  ;;  %v1444_v42 = vpop.permute.xlu1 %1443 }
  0xb4   : > { %2243 = vmatmul.mubr.msk.bf16.gmra.mrb[4].mxu0 %vm470_vm3, %v2653_v51  ;;  %v2406_v51 = vld [vmem:[%s2919_s2 + $0x88] sm:$0xff]  }
  0xb5   : > { %2250 = vmatprep.mubr.msk.bf16.mxu0 %vm470_vm3, %v1438_v36 }
  0xb6   : > { %2191 = vmatmul.mubr.msk.bf16.vlgmr.msra.gmra.mrb[0].mxu1 %vm470_vm3, %v2000_v34  ;;  %v2085_v34 = vld [vmem:[%s2920_s3] ss:$0 sm:$0xff] }
  0xb7   : > { %2194 = vmatprep.mubr.msk.bf16.mxu1 %vm470_vm3, %v2001_v43  ;;  %2199 = vmatpush3.bf16.msra.mxu1 %v2403_v10 }
  0xb8   : > { %2200 = vmatprep.subr.bf16.mxu1 %v2405_v11 }
  0xbb   : > { %2201 = vmatpush3.bf16.msra.mxu1 %v2405_v11 }
  0xbc   : > { %2251 = vmatmul.mubr.msk.bf16.vlgmr.msra.gmra.mrb[0].mxu0 %vm470_vm3, %v1440_v52 }
  0xbd   : > { %2259 = vmatpush3.bf16.msra.mxu0 %v2404_v20  ;;  %2254 = vmatprep.mubr.msk.bf16.mxu0 %vm470_vm3, %v1442_v22  ;;  %v2086_v20 = vld [vmem:[%s2922_s5] ss:$0 sm:$0xff] }
  0xbe   : > { %2260 = vmatprep.subr.bf16.mxu0 %v2406_v51  ;;  %2195 = vmatmul.mubr.msk.bf16.gmra.mrb[4].mxu1 %vm470_vm3, %v2002_v61 }
  0xbf   : > { %2202 = vmatprep.mubr.msk.bf16.mxu1 %vm470_vm3, %v2519_v8  ;;  %v2407_v8 = vld [vmem:[%s2921_s4] sm:$0xff]  }
  0xc0   : > { %2270 = vmatprep.subr.bf16.mxu1 %v2407_v8 }
  0xc1   : > { %2261 = vmatpush3.bf16.msra.mxu0 %v2406_v51 }
  0xc4   : > { %2255 = vmatmul.mubr.msk.bf16.gmra.mrb[4].mxu0 %vm470_vm3, %v1444_v42 }
  0xc5   : > { %2262 = vmatprep.mubr.msk.bf16.mxu0 %vm470_vm3, %v2075_v18 }
  0xc6   : > { %2203 = vmatmul.mubr.msk.bf16.vlgmr.msra.gmra.mrb[0].mxu1 %vm470_vm3, %v2532_v30  ;;  %v2409_v30 = vld [vmem:[%s2921_s4 + $0x10] sm:$0xff]  }
  0xc7   : > { %2206 = vmatprep.mubr.msk.bf16.mxu1 %vm470_vm3, %v2522_v14  ;;  %2271 = vmatpush3.bf16.msra.mxu1 %v2407_v8  ;;  %v2408_v14 = vld [vmem:[%s2921_s4 + $0x8] sm:$0xff]  }
  0xc8   : > { %2272 = vmatprep.subr.bf16.mxu1 %v2408_v14 }
  0xcb   : > { %2273 = vmatpush3.bf16.msra.mxu1 %v2408_v14 }
  0xcc   : > { %2263 = vmatmul.mubr.msk.bf16.vlgmr.msra.gmra.mrb[0].mxu0 %vm470_vm3, %v2076_v25  ;;  %2274 = vmatprep.subr.bf16.mxu1 %v2409_v30 }
  0xcd   : > { %2266 = vmatprep.mubr.msk.bf16.mxu0 %vm470_vm3, %v2077_v1 }
  0xce   : > { %2207 = vmatmul.mubr.msk.bf16.gmra.mrb[4].mxu1 %vm470_vm3, %v2549_v54  ;;  %v2410_v54 = vld [vmem:[%s2921_s4 + $0x18] sm:$0xff]  }
  0xcf   : > { %2275 = vmatpush3.bf16.msra.mxu1 %v2409_v30 }
  0xd0   : > { %2276 = vmatprep.subr.bf16.mxu1 %v2410_v54 }
  0xd3   : > { %2277 = vmatpush3.bf16.msra.mxu1 %v2410_v54 }
  0xd4   : > { %2267 = vmatmul.mubr.msk.bf16.gmra.mrb[4].mxu0 %vm470_vm3, %v2752_v41 }
 0x199   : > { %v2204_v9 = vpop.f32.mrb[0].mxu1 }
 0x19a   : > { %v949_v21 = vpop.f32.mrb[1].mxu1 }
 0x19b   : > { %v2205_v33 = vpop.f32.mrb[2].mxu1 }
 0x19c   : > { %v952_v62 = vpop.f32.mrb[3].mxu1 }
 0x19f   : > { %v2264_v58 = vpop.f32.mrb[0].mxu0 }
 0x1a0   : > { %v2286_v4 = vadd.f32 %v2264_v58, %v2204_v9  ;;  %v1624_v15 = vpop.f32.mrb[1].mxu0 }
 0x1a1   : > { %v2287_v39 = vadd.f32 %v1624_v15, %v949_v21  ;;  %v2265_v40 = vpop.f32.mrb[2].mxu0  ;;  %v2208_v44 = vpop.f32.mrb[4].mxu1 }
 0x1a2   : > { %v1672_v45 = vadd.f32 %v2286_v4, %v2085_v34  ;;  %v2288_v13 = vadd.f32 %v2265_v40, %v2205_v33  ;;  %v1627_v25 = vpop.f32.mrb[3].mxu0  ;;  %v965_v46 = vpop.f32.mrb[5].mxu1 }
 0x1a3   : > { %v1670_v37 = vadd.f32 %v2287_v39, %v2085_v34  ;;  %v2289_v48 = vadd.f32 %v1627_v25, %v952_v62  ;;  %v2209_v49 = vpop.f32.mrb[6].mxu1 }
 0x1a4   : > { %v1688_v29 = vmul.f32 0.2, %v1672_v45  ;;  %v1673_v31 = vadd.f32 %v2288_v13, %v2085_v34  ;;  %v968_v50 = vpop.f32.mrb[7].mxu1  ;;  %vm1680_vm4 = vcmp.gt.f32.partialorder %v1672_v45, 0.0 }
 0x1a5   : > { %v1686_v43 = vmul.f32 0.2, %v1670_v37  ;;  %v1671_v60 = vadd.f32 %v2289_v48, %v2085_v34  ;;  %vm1678_vm5 = vcmp.gt.f32.partialorder %v1670_v37, 0.0 }
 0x1a6   : > { %vm1681_vm6 = vcmp.gt.f32.partialorder %v1673_v31, 0.0  ;;  %v1689_v47 = vmul.f32 0.2, %v1673_v31  ;;  %v1696_v56 = vsel %vm1680_vm4, %v1672_v45, %v1688_v29 }
 0x1a7   : > { %vm1679_vm7 = vcmp.gt.f32.partialorder %v1671_v60, 0.0  ;;  %v1687_v61 = vmul.f32 0.2, %v1671_v60  ;;  %v2268_v5 = vpop.f32.mrb[4].mxu0  ;;  %v1694_v53 = vsel %vm1678_vm5, %v1670_v37, %v1686_v43 }
 0x1a8   : > { %v1697_v6 = vsel %vm1681_vm6, %v1673_v31, %v1689_v47  ;;  %v2290_v7 = vadd.f32 %v2268_v5, %v2208_v44  ;;  %v1640_v12 = vpop.f32.mrb[5].mxu0 }
 0x1a9   : > { %v1703_v16 = vpack.c.bf16 %v1697_v6, %v1696_v56  ;;  %v1695_v18 = vsel %vm1679_vm7, %v1671_v60, %v1687_v61  ;;  %v2291_v1 = vadd.f32 %v1640_v12, %v965_v46  ;;  %v2269_v17 = vpop.f32.mrb[6].mxu0 }
 0x1aa   : > { %v1676_v41 = vadd.f32 %v2290_v7, %v2085_v34  ;;  %v2292_v23 = vadd.f32 %v2269_v17, %v2209_v49  ;;  %v1643_v24 = vpop.f32.mrb[7].mxu0  ;;  %v1702_v32 = vpack.c.bf16 %v1695_v18, %v1694_v53 }
 0x1ab   : > { %v1674_v19 = vadd.f32 %v2291_v1, %v2085_v34  ;;  %v2293_v57 = vadd.f32 %v1643_v24, %v968_v50 }
 0x1ac   : > { %v1692_v55 = vmul.f32 0.2, %v1676_v41  ;;  %v1677_v26 = vadd.f32 %v2292_v23, %v2085_v34  ;;  %2278 = vmatprep.mubr.msk.bf16.mxu1 %vm1745_vm8, %v1702_v32  ;;  %vm1684_vm9 = vcmp.gt.f32.partialorder %v1676_v41, 0.0 }
 0x1ad   : > { %v1690_v3 = vmul.f32 0.2, %v1674_v19  ;;  %v1675_v27 = vadd.f32 %v2293_v57, %v2085_v34  ;;  %2279 = vmatmul.mubr.msk.bf16.vlgmr.msra.gmra.mrb[8].mxu1 %vm1745_vm8, %v1703_v16  ;;  %vm1682_vm10 = vcmp.gt.f32.partialorder %v1674_v19, 0.0 }
 0x1ae   : > { %vm1685_vm11 = vcmp.gt.f32.partialorder %v1677_v26, 0.0  ;;  %v1693_v63 = vmul.f32 0.2, %v1677_v26  ;;  %v1700_v59 = vsel %vm1684_vm9, %v1676_v41, %v1692_v55 }
 0x1af   : > { %vm1683_vm12 = vcmp.gt.f32.partialorder %v1675_v27, 0.0  ;;  %v1691_v35 = vmul.f32 0.2, %v1675_v27  ;;  %v1698_v2 = vsel %vm1682_vm10, %v1674_v19, %v1690_v3 }
 0x1b0   : > { %v1701_v38 = vsel %vm1685_vm11, %v1677_v26, %v1693_v63 }
 0x1b1   : > { %v1699_v28 = vsel %vm1683_vm12, %v1675_v27, %v1691_v35  ;;  %v1705_v0 = vpack.c.bf16 %v1701_v38, %v1700_v59 }
 0x1b2   : > { %v1704_v10 = vpack.c.bf16 %v1699_v28, %v1698_v2 }
 0x1b4   : > { %2282 = vmatprep.mubr.msk.bf16.mxu1 %vm1745_vm8, %v1704_v10 }
 0x1b5   : > { %2283 = vmatmul.mubr.msk.bf16.gmra.mrb[12].mxu1 %vm1745_vm8, %v1705_v0 }
 0x280   : > { %v2280_v36 = vpop.f32.mrb[8].mxu1 }
 0x281   : > { %v1801_v11 = vadd.f32 %v2280_v36, %v2086_v20  ;;  %v1792_v52 = vpop.f32.mrb[9].mxu1 }
 0x282   : > { %v1793_v22 = vadd.f32 %v2086_v20, %v1792_v52  ;;  %v2281_v51 = vpop.f32.mrb[10].mxu1 }
 0x283   : > { %vm1825_vm13 = vcmp.gt.f32.partialorder %v1801_v11, 0.0  ;;  %v1833_v42 = vmul.f32 0.2, %v1801_v11  ;;  %v1804_v8 = vadd.f32 %v2281_v51, %v2086_v20  ;;  %v1795_v14 = vpop.f32.mrb[11].mxu1 }
 0x284   : > { %vm1823_vm14 = vcmp.gt.f32.partialorder %v1793_v22, 0.0  ;;  %v1831_v30 = vmul.f32 0.2, %v1793_v22  ;;  %v1796_v54 = vadd.f32 %v2086_v20, %v1795_v14 }
 0x285   : > { %v1841_v9 = vsel %vm1825_vm13, %v1801_v11, %v1833_v42  ;;  %vm1826_vm15 = vcmp.gt.f32.partialorder %v1804_v8, 0.0  ;;  %v1834_v21 = vmul.f32 0.2, %v1804_v8 }
 0x286   : > { %1849 = vst.msk [vmem:[%s2890_s25 + $0x10] sm:$0xff] %vm1745_vm8, %v1841_v9  ;;  %v1839_v33 = vsel %vm1823_vm14, %v1793_v22, %v1831_v30  ;;  %vm1824_vm0 = vcmp.gt.f32.partialorder %v1796_v54, 0.0  ;;  %v1832_v62 = vmul.f32 0.2, %v1796_v54 }
 0x287   : > { %1847 = vst.msk [vmem:[%s2890_s25] sm:$0xff] %vm1745_vm8, %v1839_v33  ;;  %v1842_v58 = vsel %vm1826_vm15, %v1804_v8, %v1834_v21 }
 0x288   : > { %1850 = vst.msk [vmem:[%s2890_s25 + $0x18] sm:$0xff] %vm1745_vm8, %v1842_v58  ;;  %v1840_v34 = vsel %vm1824_vm0, %v1796_v54, %v1832_v62  ;;  %v2284_v4 = vpop.f32.mrb[12].mxu1 }
 0x289   : > { %1848 = vst.msk [vmem:[%s2890_s25 + $0x8] sm:$0xff] %vm1745_vm8, %v1840_v34  ;;  %v1817_v15 = vadd.f32 %v2284_v4, %v2086_v20  ;;  %v1808_v39 = vpop.f32.mrb[13].mxu1 }
 0x28a   : > { %v1809_v40 = vadd.f32 %v2086_v20, %v1808_v39  ;;  %v2285_v44 = vpop.f32.mrb[14].mxu1 }
 0x28b   : > { %vm1829_vm1 = vcmp.gt.f32.partialorder %v1817_v15, 0.0  ;;  %v1837_v45 = vmul.f32 0.2, %v1817_v15  ;;  %v1820_v13 = vadd.f32 %v2285_v44, %v2086_v20  ;;  %v1811_v25 = vpop.f32.mrb[15].mxu1 }
 0x28c   : > { %vm1827_vm2 = vcmp.gt.f32.partialorder %v1809_v40, 0.0  ;;  %v1835_v46 = vmul.f32 0.2, %v1809_v40  ;;  %v1812_v37 = vadd.f32 %v2086_v20, %v1811_v25 }
 0x28d   : > { %v1845_v48 = vsel %vm1829_vm1, %v1817_v15, %v1837_v45  ;;  %vm1830_vm3 = vcmp.gt.f32.partialorder %v1820_v13, 0.0  ;;  %v1838_v49 = vmul.f32 0.2, %v1820_v13 }
 0x28e   : > { %1853 = vst.msk [vmem:[%s2890_s25 + $0x30] sm:$0xff] %vm1745_vm8, %v1845_v48  ;;  %v1843_v29 = vsel %vm1827_vm2, %v1809_v40, %v1835_v46  ;;  %vm1828_vm4 = vcmp.gt.f32.partialorder %v1812_v37, 0.0  ;;  %v1836_v31 = vmul.f32 0.2, %v1812_v37 }
 0x28f   : > { %1851 = vst.msk [vmem:[%s2890_s25 + $0x20] sm:$0xff] %vm1745_vm8, %v1843_v29  ;;  %v1846_v50 = vsel %vm1830_vm3, %v1820_v13, %v1838_v49 }
 0x290   : > { %1854 = vst.msk [vmem:[%s2890_s25 + $0x38] sm:$0xff] %vm1745_vm8, %v1846_v50  ;;  %v1844_v43 = vsel %vm1828_vm4, %v1812_v37, %v1836_v31 }
 0x291   : > { %1852 = vst.msk [vmem:[%s2890_s25 + $0x28] sm:$0xff] %vm1745_vm8, %v1844_v43 }
 0x292 PF: > { %s16_s23 = sadd.s32 1, %s2433_s23   ;;  %s2926_s21 = smov %s2429_s22 }
 0x293   : > { %p13_p5 = scmp.ge.s32.totalorder %s16_s23, 4   ;;  %s2927_s22 = smov %s2929_s24 }
 0x295   :  { %15 = sbr.rel (!%p13_p5) target bundleno = 2 (0x2), region = 85 }

// kernel: feature_pyramid_forward.3
= control target key start
LH: loop header
LB: loop body
LE: loop exit
PB: predicated region body
PF: predicated region fallthrough
CT: control target
= control target key end

     0   :  { %11 = vsyncpa [#allocation3], 0  ;;  %s2701_s0 = inlined_call_operand.vmem [shape: bf16[2,5,2,5,128], index: 0, kind: input, shape index: {}, may-alias: {0,1}]   ;;  %s2702_s1 = inlined_call_operand.vmem [shape: bf16[2,5,2,5,128], index: 1, kind: input, shape index: {}, may-alias: {0,1}]   ;;  %s2703_s2 = inlined_call_operand.vmem [shape: bf16[9,64,128], index: 2, kind: input, shape index: {}]   ;;  %s2704_s3 = inlined_call_operand.vmem [shape: f32[1,128], index: 3, kind: input, shape index: {}]   ;;  %s2705_s4 = inlined_call_operand.vmem [shape: bf16[128,128], index: 4, kind: input, shape index: {}]   ;;  %s2706_s5 = inlined_call_operand.vmem [shape: f32[1,128], index: 5, kind: input, shape index: {}]   ;;  %s2707_s6 = inlined_call_operand.hbm [shape: f32[2,4,4,128], index: 6, kind: output, shape index: {}]  }
   0x1   :  { %13 = vsyncpa [#allocation3 + $0x1], 0  ;;  %s2223_s21 = smov 0   ;;  %s2225_s22 = smov 0  }
   0x2   :  { %s2227_s23 = smov 0   ;;  %s2229_s24 = smov 0  }
   0x3   :  { %s2231_s25 = smov 0   ;;  %s2233_s26 = smov 0  }
   0x4 LB: > { %s1673_s27 = sadd.s32 4294967295, %s2180_s26   ;;  %s1674_s28 = sadd.s32 4294967294, %s2180_s26   ;;  %s2180_s26 = sphi %s2233_s26, %s19_s26   ;;  %s2176_s25 = sphi %s2231_s25, %s2716_s25   ;;  %s2172_s24 = sphi %s2229_s24, %s2715_s24   ;;  %s2168_s23 = sphi %s2227_s23, %s2714_s23   ;;  %s2164_s22 = sphi %s2225_s22, %s2713_s22   ;;  %s2160_s21 = sphi %s2223_s21, %s2712_s21  }
   0x5   : > { %s31_s29 = sadd.s32 1, %s2176_s25  ;;  %s188_s30 = sadd.s32 1, %s2168_s23 }
   0x6   : > { %p33_p0 = scmp.ge.s32.totalorder %s31_s29, 2  ;;  %p198_p1 = scmp.ne.s32.totalorder %s2168_s23, %s2164_s22 }
   0x7   : > { %p199_p2 = scmp.eq.s32.totalorder %s1673_s27, 1  ;;  %p204_p3 = scmp.ne.s32.totalorder %s2164_s22, %s2160_s21 }
   0x8   : > { %s2718_s29 = smov (%p33_p0, %s31_s29), 0  ;;  %p205_p5 = scmp.eq.s32.totalorder %s1674_s28, 1 }
   0x9   : > { %p2263_p4 = por %p199_p2, %p198_p1  ;;  %s183_s8 = ssub.s32 %s2176_s25, %s2718_s29 }
   0xa   : > { %p1677_p6 = scmp.ge.s32.totalorder %s2180_s26, 1  ;;  %p186_p7 = scmp.eq.s32.totalorder %s183_s8, 0 }
   0xb   : > { %p2270_p8 = por %p205_p5, %p204_p3  ;;  %p279_p9 = scmp.lt.s32.totalorder %s2180_s26, 3 }
   0xc   : > { %s2276_s10 = scalar_select %p186_p7, %s2168_s23, %s188_s30  }
   0xd   : > { %p280_p10 = pnand %p1677_p6, %p279_p9 }
   0xe   : > { %p338_p11 = scmp.lt.s32.totalorder (!%p280_p10), %s2172_s24, 1  ;;  %v407_v0 = vlaneseq (!%p280_p10)  ;;  %v2058_v1 = vld [vmem:[%s2703_s2 + $0x20] sm:$0xff] (!%p280_p10)   ;;  %v2182_v2 = vmov (!%p280_p10), 1983009808   ;;  %v2183_v4 = vmov (!%p280_p10), 0.0   ;;  %v2060_v7 = vld [vmem:[%s2703_s2 + $0x28] sm:$0xff] (!%p280_p10)  }
   0xf   : > { %283 = sbr.rel (%p280_p10) target bundleno = 673 (0x2a1), region = 44  ;;  %v405_v3 = vunpack.c.l.s4 (!%p280_p10), %v2182_v2  ;;  %1862 = vmatprep.subr.bf16.mxu0 (!%p280_p10), %v2183_v4  ;;  %1874 = vmatprep.subr.bf16.mxu1 (!%p280_p10), %v2183_v4  ;;  %v2059_v6 = vld [vmem:[%s2703_s2] sm:$0xff] (!%p280_p10)   ;;  %v2061_v9 = vld [vmem:[%s2703_s2 + $0x8] sm:$0xff] (!%p280_p10)   ;;  %v2062_v11 = vld [vmem:[%s2703_s2 + $0x30] sm:$0xff] (!%p280_p10)   ;;  %s2184_s20 = smov (!%p280_p10), 64   ;;  %vm445_vm0 = vcmask (!%p280_p10), 523264  }
  0x10   : > { %v408_v5 = vshrl.u32 (!%p280_p10), %v407_v0, 7  ;;  %1863 = vmatpush3.bf16.msra.mxu0 (!%p280_p10), %v2058_v1  ;;  %1875 = vmatpush3.bf16.msra.mxu1 (!%p280_p10), %v2059_v6  ;;  %v2063_v20 = vld [vmem:[%s2703_s2 + $0x10] sm:$0xff] (!%p280_p10)   ;;  %v2064_v24 = vld [vmem:[%s2703_s2 + $0x38] sm:$0xff] (!%p280_p10)   ;;  %vm590_vm1 = vsmask.f32 (!%p280_p10), 1280  ;;  %vm2185_vm2 = vmmov (!%p280_p10), 0  }
  0x11   : > { %v406_v8 = vunpack.c.0.s8 (!%p280_p10), %v405_v3  ;;  %1864 = vmatprep.subr.bf16.mxu0 (!%p280_p10), %v2183_v4  ;;  %1876 = vmatprep.subr.bf16.mxu1 (!%p280_p10), %v2183_v4  ;;  %v2065_v29 = vld [vmem:[%s2703_s2 + $0x18] sm:$0xff] (!%p280_p10)   ;;  %vm591_vm3 = vsmask.f32 (!%p280_p10), 3336  ;;  %vm593_vm4 = vsmask.f32 (!%p280_p10), 5392  ;;  %s1807_s11 = sshll.u32 (!%p280_p10), %s2172_s24, 8 }
  0x12   : > { %1870 = vmatprep.mubr.msk.bf16.mxu0 (!%p280_p10), %vm2185_vm2, %v2183_v4  ;;  %1882 = vmatprep.mubr.msk.bf16.mxu1 (!%p280_p10), %vm2185_vm2, %v2183_v4  ;;  %vm592_vm5 = vmor (!%p280_p10), %vm590_vm1, %vm591_vm3  ;;  %vm595_vm6 = vsmask.f32 (!%p280_p10), 7448  ;;  %s2651_s15 = scalar_lea.hbm (!%p280_p10), %s2707_s6, %s1807_s11  ;;  %s2186_s17 = smov (!%p280_p10), [#allocation2]  }
  0x13   : > { %v2306_v10 = vsub.s32 (!%p280_p10), %v406_v8, %v408_v5  ;;  %vm594_vm7 = vmor (!%p280_p10), %vm592_vm5, %vm593_vm4  ;;  %s2106_s19 = sshll.u32 (!%p280_p10), %s2186_s17, 4  ;;  %s2107_s19 = int_to_ptr.vmem [resolvable:$false] %s2106_s19 }
  0x14   : > { %1865 = vmatpush3.bf16.msra.mxu0 (!%p280_p10), %v2060_v7  ;;  %1877 = vmatpush3.bf16.msra.mxu1 (!%p280_p10), %v2061_v9  ;;  %vm2423_vm8 = vmor (!%p280_p10), %vm594_vm7, %vm595_vm6 }
  0x15   : > { %1866 = vmatprep.subr.bf16.mxu0 (!%p280_p10), %v2183_v4  ;;  %1878 = vmatprep.subr.bf16.mxu1 (!%p280_p10), %v2183_v4 }
  0x16   : > { %s2285_s13 = scalar_select %p338_p11, %s2172_s24, 1 }
  0x18   : > { %s1990_s18 = smul.u32 40, %s2285_s13  ;;  %1867 = vmatpush3.bf16.msra.mxu0 %v2062_v11  ;;  %1879 = vmatpush3.bf16.msra.mxu1 %v2063_v20  ;;  %s2108_s13 = scalar_lea.vmem %s2107_s19, 512 }
  0x19   : > { %1868 = vmatprep.subr.bf16.mxu0 %v2183_v4  ;;  %1880 = vmatprep.subr.bf16.mxu1 %v2183_v4 }
  0x1a   : > { %s2304_s30 = scalar_lea.vmem %s2701_s0, %s1990_s18  ;;  %s1806_s27 = sadd.s32 32, %s1990_s18 }
  0x1b   : > { %v372_v12 = vld [vmem:[%s2304_s30] sm:$0x7]  ;;  %v2313_v13 = vld [vmem:[%s2304_s30 + $0x8] sm:$0x7]  ;;  %v2316_v14 = vld [vmem:[%s2304_s30 + $0x10] sm:$0x7]  ;;  %s365_s28 = scalar_lea.vmem %s2702_s1, %s1806_s27 }
  0x1c   : > { %v2320_v15 = vld [vmem:[%s2304_s30 + $0x18] sm:$0x7]  ;;  %v402_v16 = vcombine.low %v372_v12, %v2313_v13  ;;  %v564_v17 = vrot.slane %v372_v12, %v2306_v10  ;;  %v572_v18 = vrot.slane %v2313_v13, %v2306_v10  ;;  %v580_v19 = vrot.slane %v2316_v14, %v2306_v10  ;;  %v373_v26 = vld [vmem:[%s2304_s30 + $0x4] sm:$0x7]  ;;  %v375_v27 = vld [vmem:[%s2304_s30 + $0xc] sm:$0x7]  ;;  %1869 = vmatpush3.bf16.msra.mxu0 %v2064_v24 }
  0x1d   : > { %v403_v21 = vcombine.low %v2316_v14, %v2320_v15  ;;  %v588_v22 = vrot.slane %v2320_v15, %v2306_v10  ;;  %v377_v28 = vld [vmem:[%s2304_s30 + $0x14] sm:$0x7]  ;;  %v379_v33 = vld [vmem:[%s2304_s30 + $0x1c] sm:$0x7]  ;;  %v762_v38 = vcombine.low %v373_v26, %v375_v27  ;;  %1886 = vmatprep.subr.bf16.mxu0 %v2183_v4  ;;  %1881 = vmatpush3.bf16.msra.mxu1 %v2065_v29  ;;  %v380_v2 = vld [vmem:[%s365_s28] sm:$0x7] }
  0x1e   : > { %v410_v23 = vrot.slane %v402_v16, %v2306_v10  ;;  %v598_v31 = vshrl.u32 %v564_v17, 16  ;;  %v601_v32 = vshll.u32 %v564_v17, 16  ;;  %v612_v34 = vshrl.u32 %v572_v18, 16  ;;  %1898 = vmatprep.subr.bf16.mxu1 %v2183_v4  ;;  %s329_s27 = sand.u32 1, %s2164_s22  }
  0x1f   : > { %v417_v25 = vrot.slane %v403_v21, %v2306_v10  ;;  %v615_v35 = vshll.u32 %v572_v18, 16  ;;  %v626_v36 = vshrl.u32 %v580_v19, 16  ;;  %v629_v37 = vshll.u32 %v580_v19, 16  ;;  %s1678_s28 = sshll.u32 %s329_s27, 4  ;;  %s2653_s16 = scalar_lea.sflag [#allocation3], %s329_s27 }
  0x20   : > { %v565_v39 = vcombine.high %v564_v17, %v564_v17  ;;  %v573_v40 = vcombine.high %v572_v18, %v572_v18  ;;  %v640_v41 = vshrl.u32 %v588_v22, 16  ;;  %v643_v42 = vshll.u32 %v588_v22, 16  ;;  %s331_s30 = scalar_lea.vmem [#allocation2], %s1678_s28 }
  0x21   : > { %v2348_v30 = vcombine.low %v410_v23, %v417_v25  ;;  %v581_v43 = vcombine.high %v580_v19, %v580_v19  ;;  %v600_v44 = vrot.slane %v598_v31, 6  ;;  %v603_v45 = vrot.slane %v601_v32, 7  ;;  %s1570_s8 = sshll.u32 %s331_s30, 4  ;;  %s2646_s8 = int_to_ptr.vmem [resolvable:$true] %s1570_s8 }
  0x22   : > { %v763_v46 = vcombine.low %v377_v28, %v379_v33  ;;  %v614_v47 = vrot.slane %v612_v34, 6  ;;  %v617_v48 = vrot.slane %v615_v35, 7  ;;  %v628_v49 = vrot.slane %v626_v36, 6  ;;  %s2102_s24 = scalar_lea.vmem %s2646_s8, 256  ;;  %p2109_p1 = scmp.lt.s32.totalorder %s2646_s8, %s2107_s19 }
  0x23   : > { %419 = vrot.lane.b32.xlu0 %v2348_v30, %s2184_s20  ;;  %v631_v50 = vrot.slane %v629_v37, 7  ;;  %v589_v51 = vcombine.high %v588_v22, %v588_v22  ;;  %v770_v52 = vrot.slane %v762_v38, %v2306_v10  ;;  %v642_v54 = vrot.slane %v640_v41, 6  ;;  %1883 = vmatmul.mubr.msk.bf16.vlgmr.msra.gmra.mrb[0].mxu1 %vm445_vm0, %v2348_v30  ;;  %p2103_p12 = scmp.ne.s32.totalorder %s2646_s8, %s2102_s24  ;;  %p2110_p2 = scmp.lt.s32.totalorder %s2108_s13, %s2102_s24 }
  0x24   : > { %v777_v53 = vrot.slane %v763_v46, %v2306_v10  ;;  %v645_v55 = vrot.slane %v643_v42, 7  ;;  %v2360_v56 = vshll.u32 %v565_v39, 16  ;;  %v2362_v57 = vshll.u32 %v573_v40, 16  ;;  %v2069_v40 = vld [vmem:[%s2703_s2 + $0x68] sm:$0xff]   ;;  %1906 = vmatprep.mubr.msk.bf16.mxu1 %vm2185_vm2, %v2183_v4 }
  0x25   : > { %v936_v59 = vrot.slane %v373_v26, %v2306_v10  ;;  %v604_v60 = vor.u32 %v603_v45, %v600_v44  ;;  %v2370_v61 = vshll.u32 %v581_v43, 16  ;;  %v618_v62 = vor.u32 %v617_v48, %v614_v47  ;;  %p2104_p13 = pnand %p2103_p12, %p2263_p4  ;;  %p2111_p3 = por %p2110_p2, %p2109_p1 }
  0x26   : > { %v2364_v58 = vcombine.low %v770_v52, %v777_v53  ;;  %v2372_v63 = vshll.u32 %v589_v51, 16  ;;  %v632_v0 = vor.u32 %v631_v50, %v628_v49  ;;  %v646_v1 = vor.u32 %v645_v55, %v642_v54  ;;  %v2071_v52 = vld [vmem:[%s2703_s2 + $0x70] sm:$0xff]  }
  0x27   : > { %v609_v3 = vrot.slane %v2360_v56, 7  ;;  %v623_v5 = vrot.slane %v2362_v57, 7  ;;  %v937_v6 = vcombine.high %v936_v59, %v936_v59  ;;  %v963_v7 = vshrl.u32 %v936_v59, 16  ;;  %v2073_v57 = vld [vmem:[%s2703_s2 + $0x78] sm:$0xff]   ;;  %v2078_v50 = vld [vmem:[%s2703_s2 + $0x90] sm:$0xff]   ;;  %p2105_p0 = pneg %p2104_p13 }
  0x28   : > { %858 = vrot.lane.b32.xlu0 %v2364_v58, %s2184_s20  ;;  %v605_v8 = vrot.slane %v604_v60, 2  ;;  %v637_v9 = vrot.slane %v2370_v61, 7  ;;  %v944_v11 = vrot.slane %v375_v27, %v2306_v10  ;;  %v966_v12 = vshll.u32 %v936_v59, 16 }
  0x29   : > { %v619_v16 = vrot.slane %v618_v62, 2  ;;  %v651_v17 = vrot.slane %v2372_v63, 7  ;;  %v952_v18 = vrot.slane %v377_v28, %v2306_v10  ;;  %v2383_v19 = vrot.slane %v379_v33, %v2306_v10  ;;  %v2067_v33 = vld [vmem:[%s2703_s2 + $0x60] sm:$0xff]   ;;  %p2112_p5 = pnand %p2111_p3, %p2105_p0 }
  0x2a   : > { %v633_v20 = vrot.slane %v632_v0, 2  ;;  %v647_v21 = vrot.slane %v646_v1, 2  ;;  %v945_v22 = vcombine.high %v944_v11, %v944_v11  ;;  %v1124_v23 = vcombine.low %v2313_v13, %v2316_v14  ;;  %1899 = vmatpush3.bf16.msra.mxu1 %v2067_v33 }
  0x2b   : > { %v965_v24 = vrot.slane %v963_v7, 6  ;;  %v2387_v25 = vshll.u32 %v937_v6, 16  ;;  %v1125_v26 = vcombine.low %v2320_v15, %v380_v2  ;;  %v2391_v27 = vrot.slane %v380_v2, %v2306_v10  ;;  %1900 = vmatprep.subr.bf16.mxu1 %v2183_v4 }
  0x2c   : > { %v968_v29 = vrot.slane %v966_v12, 7  ;;  %v977_v31 = vshrl.u32 %v944_v11, 16  ;;  %v980_v28 = vshll.u32 %v944_v11, 16  ;;  %v1132_v32 = vrot.slane %v1124_v23, %v2306_v10 }
  0x2d   : > { %v953_v34 = vcombine.high %v952_v18, %v952_v18  ;;  %v991_v35 = vshrl.u32 %v952_v18, 16  ;;  %v994_v13 = vshll.u32 %v952_v18, 16  ;;  %v1139_v14 = vrot.slane %v1125_v26, %v2306_v10 }
  0x2e   : > { %v1005_v36 = vshrl.u32 %v2383_v19, 16  ;;  %v974_v15 = vrot.slane %v2387_v25, 7  ;;  %v2400_v37 = vshll.u32 %v945_v22, 16  ;;  %v1008_v38 = vshll.u32 %v2383_v19, 16  ;;  %1901 = vmatpush3.bf16.msra.mxu1 %v2069_v40 }
  0x2f   : > { %v2403_v39 = vcombine.low %v1132_v32, %v1139_v14  ;;  %v979_v41 = vrot.slane %v977_v31, 6  ;;  %v982_v42 = vrot.slane %v980_v28, 7  ;;  %v993_v43 = vrot.slane %v991_v35, 6  ;;  %1902 = vmatprep.subr.bf16.mxu1 %v2183_v4  ;;  %v2079_v28 = vld [vmem:[%s2703_s2 + $0xb0] sm:$0xff]  }
  0x30   : > { %v996_v44 = vrot.slane %v994_v13, 7  ;;  %v1000_v45 = vshll.u32 %v953_v34, 16  ;;  %v1007_v46 = vrot.slane %v1005_v36, 6  ;;  %v961_v30 = vcombine.high %v2383_v19, %v2383_v19  ;;  %v2081_v34 = vld [vmem:[%s2703_s2 + $0xb8] sm:$0xff]  }
  0x31   : > { %1220 = vrot.lane.b32.xlu1 %v2403_v39, %s2184_s20  ;;  %v969_v47 = vor.u32 %v968_v29, %v965_v24  ;;  %v1010_v48 = vrot.slane %v1008_v38, 7  ;;  %v1301_v49 = vshrl.u32 %v2391_v27, 16  ;;  %v1304_v51 = vshll.u32 %v2391_v27, 16  ;;  %v2083_v38 = vld [vmem:[%s2703_s2 + $0xe0] sm:$0xff]  }
  0x32   : > { %v610_v53 = vsel %vm2423_vm8, %v605_v8, %v609_v3  ;;  %v624_v54 = vsel %vm2423_vm8, %v619_v16, %v623_v5  ;;  %v638_v55 = vsel %vm2423_vm8, %v633_v20, %v637_v9  ;;  %v983_v59 = vor.u32 %v982_v42, %v979_v41  ;;  %1903 = vmatpush3.bf16.msra.mxu1 %v2071_v52  ;;  %v2085_v41 = vld [vmem:[%s2703_s2 + $0xe8] sm:$0xff]   ;;  %v2089_v42 = vld [vmem:[%s2703_s2 + $0xf8] sm:$0xff]  }
  0x33   : > { %v997_v60 = vor.u32 %v996_v44, %v993_v43  ;;  %v652_v61 = vsel %vm2423_vm8, %v647_v21, %v651_v17  ;;  %v662_v62 = vcombine.low %v610_v53, %v624_v54  ;;  %v970_v63 = vrot.slane %v969_v47, 2  ;;  %1904 = vmatprep.subr.bf16.mxu1 %v2183_v4  ;;  %v2075_v17 = vld [vmem:[%s2703_s2 + $0xa0] sm:$0xff]   ;;  %v2077_v21 = vld [vmem:[%s2703_s2 + $0xa8] sm:$0xff]  }
  0x34   : > { %v663_v56 = vcombine.low %v638_v55, %v652_v61  ;;  %v988_v0 = vrot.slane %v2400_v37, 7  ;;  %v1002_v2 = vrot.slane %v1000_v45, 7  ;;  %v1014_v3 = vshll.u32 %v961_v30, 16  ;;  %v2066_v43 = vld [vmem:[%s2703_s2 + $0x40] sm:$0xff]   ;;  %v2068_v45 = vld [vmem:[%s2703_s2 + $0x48] sm:$0xff]   ;;  %v2072_v30 = vld [vmem:[%s2703_s2 + $0x58] sm:$0xff]  }
  0x35   : > { %v2449_v1 = vrot.slane %v662_v62, %v2306_v10  ;;  %v984_v6 = vrot.slane %v983_v59, 2  ;;  %v998_v7 = vrot.slane %v997_v60, 2  ;;  %v1011_v8 = vor.u32 %v1010_v48, %v1007_v46  ;;  %v2070_v46 = vld [vmem:[%s2703_s2 + $0x50] sm:$0xff]   ;;  %v2074_v47 = vld [vmem:[%s2703_s2 + $0x80] sm:$0xff]   ;;  %v2076_v48 = vld [vmem:[%s2703_s2 + $0x88] sm:$0xff]  }
  0x36   : > { %v2452_v5 = vrot.slane %v663_v56, %v2306_v10  ;;  %v1303_v9 = vrot.slane %v1301_v49, 6  ;;  %v1306_v11 = vrot.slane %v1304_v51, 7  ;;  %v1299_v16 = vcombine.high %v2391_v27, %v2391_v27  ;;  %1905 = vmatpush3.bf16.msra.mxu1 %v2073_v57  ;;  %v2080_v51 = vld [vmem:[%s2703_s2 + $0x98] sm:$0xff]   ;;  %v2082_v53 = vld [vmem:[%s2703_s2 + $0xc0] sm:$0xff]   ;;  %v2092_v62 = vld [vmem:[%s2703_s2 + $0x110] sm:$0xff]  }
  0x37   : > { %v1012_v18 = vrot.slane %v1011_v8, 2  ;;  %v1016_v19 = vrot.slane %v1014_v3, 7  ;;  %1922 = vmatprep.subr.bf16.mxu1 %v2183_v4  ;;  %v975_v23 = vsel %vm2423_vm8, %v970_v63, %v974_v15  ;;  %v989_v24 = vsel %vm2423_vm8, %v984_v6, %v988_v0  ;;  %v2088_v59 = vld [vmem:[%s2703_s2 + $0xd8] sm:$0xff]   ;;  %v2090_v60 = vld [vmem:[%s2703_s2 + $0x100] sm:$0xff]   ;;  %v2096_v8 = vld [vmem:[%s2705_s4 + $0x10] sm:$0xff]  }
  0x38   : > { %v678_v12 = vcombine.low %v2449_v1, %v2452_v5  ;;  %v1310_v20 = vshll.u32 %v1299_v16, 16  ;;  %v1307_v22 = vor.u32 %v1306_v11, %v1303_v9  ;;  %v1003_v26 = vsel %vm2423_vm8, %v998_v7, %v1002_v2  ;;  %v2094_v1 = vld [vmem:[%s2705_s4] sm:$0xff]   ;;  %v2095_v2 = vld [vmem:[%s2705_s4 + $0x8] sm:$0xff]   ;;  %v2097_v9 = vld [vmem:[%s2705_s4 + $0x18] sm:$0xff]  }
  0x39   : > { %1907 = vmatmul.mubr.msk.bf16.vlgmr.msra.gmra.mrb[4].mxu1 %vm445_vm0, %v2364_v58  ;;  %v1017_v27 = vsel %vm2423_vm8, %v1012_v18, %v1016_v19  ;;  %v1027_v58 = vcombine.low %v975_v23, %v989_v24  ;;  %v1323_v13 = vcombine.low %v624_v54, %v638_v55  ;;  %v2084_v54 = vld [vmem:[%s2703_s2 + $0xc8] sm:$0xff]   ;;  %v2086_v55 = vld [vmem:[%s2703_s2 + $0xd0] sm:$0xff]   ;;  %v2098_v11 = vld [vmem:[%s2705_s4 + $0x20] sm:$0xff]  }
  0x3a   : > { %1923 = vmatpush3.bf16.msra.mxu1 %v2075_v17  ;;  %1930 = vmatprep.mubr.msk.bf16.mxu1 %vm2185_vm2, %v2183_v4  ;;  %v1028_v25 = vcombine.low %v1003_v26, %v1017_v27  ;;  %v1308_v29 = vrot.slane %v1307_v22, 2  ;;  %v1312_v31 = vrot.slane %v1310_v20, 7  ;;  %v2100_v20 = vld [vmem:[%s2705_s4 + $0x30] sm:$0xff]  }
  0x3b   : > { %1924 = vmatprep.subr.bf16.mxu1 %v2183_v4  ;;  %v1035_v32 = vrot.slane %v1027_v58, %v2306_v10  ;;  %v2494_v15 = vrot.slane %v1323_v13, %v2306_v10 }
  0x3c   : > { %v1042_v33 = vrot.slane %v1028_v25, %v2306_v10  ;;  %v1313_v35 = vsel %vm2423_vm8, %v1308_v29, %v1312_v31 }
  0x3d   : > { %v1324_v14 = vcombine.low %v652_v61, %v1313_v35  ;;  %v2091_v61 = vld [vmem:[%s2703_s2 + $0x108] sm:$0xff]  }
  0x3e   : > { %1925 = vmatpush3.bf16.msra.mxu1 %v2077_v21  ;;  %v1043_v36 = vcombine.low %v1035_v32, %v1042_v33  ;;  %v2101_v21 = vld [vmem:[%s2705_s4 + $0x38] sm:$0xff]  }
  0x3f   : > { %1926 = vmatprep.subr.bf16.mxu1 %v2183_v4  ;;  %v2497_v37 = vrot.slane %v1324_v14, %v2306_v10  ;;  %v2087_v10 = vld [vmem:[%s2703_s2 + $0xf0] sm:$0xff]  }
  0x41   : > { %v1339_v40 = vcombine.low %v2494_v15, %v2497_v37 }
  0x42   : > { %1927 = vmatpush3.bf16.msra.mxu1 %v2079_v28 }
  0x43   : > { %1928 = vmatprep.subr.bf16.mxu1 %v2183_v4 }
  0x46   : > { %1929 = vmatpush3.bf16.msra.mxu1 %v2081_v34 }
  0x47   : > { %1946 = vmatprep.subr.bf16.mxu1 %v2183_v4 }
  0x49   : > { %1931 = vmatmul.mubr.msk.bf16.vlgmr.msra.gmra.mrb[8].mxu1 %vm445_vm0, %v1043_v36 }
  0x4a   : > { %1947 = vmatpush3.bf16.msra.mxu1 %v2083_v38  ;;  %1954 = vmatprep.mubr.msk.bf16.mxu1 %vm2185_vm2, %v2183_v4 }
  0x4b   : > { %1948 = vmatprep.subr.bf16.mxu1 %v2183_v4 }
  0x4e   : > { %1949 = vmatpush3.bf16.msra.mxu1 %v2085_v41 }
  0x4f   : > { %1950 = vmatprep.subr.bf16.mxu1 %v2183_v4 }
  0x52   : > { %1951 = vmatpush3.bf16.msra.mxu1 %v2087_v10 }
  0x53   : > { %1952 = vmatprep.subr.bf16.mxu1 %v2183_v4 }
  0x56   : > { %1953 = vmatpush3.bf16.msra.mxu1 %v2089_v42 }
  0x57   : > { %1970 = vmatprep.subr.bf16.mxu1 %v2183_v4 }
  0x95   : > { %v420_v44 = vpop.permute.xlu0 %419 }
  0x96   : > { %1871 = vmatmul.mubr.msk.bf16.vlgmr.msra.gmra.mrb[0].mxu0 %vm445_vm0, %v420_v44 }
  0x97   : > { %1887 = vmatpush3.bf16.msra.mxu0 %v2066_v43  ;;  %1894 = vmatprep.mubr.msk.bf16.mxu0 %vm2185_vm2, %v2183_v4 }
  0x98   : > { %1888 = vmatprep.subr.bf16.mxu0 %v2183_v4 }
  0x9a   : > { %v859_v52 = vpop.permute.xlu0 %858 }
  0x9b   : > { %1889 = vmatpush3.bf16.msra.mxu0 %v2068_v45 }
  0x9c   : > { %1890 = vmatprep.subr.bf16.mxu0 %v2183_v4 }
  0x9f   : > { %1891 = vmatpush3.bf16.msra.mxu0 %v2070_v46 }
  0xa0   : > { %1892 = vmatprep.subr.bf16.mxu0 %v2183_v4 }
  0xa3   : > { %1893 = vmatpush3.bf16.msra.mxu0 %v2072_v30  ;;  %v1221_v49 = vpop.permute.xlu1 %1220 }
  0xa4   : > { %1910 = vmatprep.subr.bf16.mxu0 %v2183_v4  ;;  %1955 = vmatmul.mubr.msk.bf16.vlgmr.msra.gmra.mrb[12].mxu1 %vm445_vm0, %v1221_v49 }
  0xa5   : > { %1986 = vmatprep.mubr.msk.bf16.mxu1 %vm2185_vm2, %v2183_v4  ;;  %1971 = vmatpush3.bf16.msra.mxu1 %v2094_v1  ;;  %v1791_v1 = vld [vmem:[%s2706_s5] ss:$0 sm:$0xff] }
  0xa6   : > { %1895 = vmatmul.mubr.msk.bf16.vlgmr.msra.gmra.mrb[4].mxu0 %vm445_vm0, %v678_v12  ;;  %1972 = vmatprep.subr.bf16.mxu1 %v2183_v4  ;;  %v2099_v12 = vld [vmem:[%s2705_s4 + $0x28] sm:$0xff]  }
  0xa7   : > { %1911 = vmatpush3.bf16.msra.mxu0 %v2074_v47  ;;  %1918 = vmatprep.mubr.msk.bf16.mxu0 %vm2185_vm2, %v2183_v4 }
  0xa8   : > { %1912 = vmatprep.subr.bf16.mxu0 %v2183_v4 }
  0xa9   : > { %1973 = vmatpush3.bf16.msra.mxu1 %v2095_v2 }
  0xaa   : > { %1974 = vmatprep.subr.bf16.mxu1 %v2183_v4 }
  0xab   : > { %1913 = vmatpush3.bf16.msra.mxu0 %v2076_v48 }
  0xac   : > { %1914 = vmatprep.subr.bf16.mxu0 %v2183_v4 }
  0xad   : > { %1975 = vmatpush3.bf16.msra.mxu1 %v2096_v8 }
  0xae   : > { %1976 = vmatprep.subr.bf16.mxu1 %v2183_v4 }
  0xaf   : > { %1915 = vmatpush3.bf16.msra.mxu0 %v2078_v50 }
  0xb0   : > { %1916 = vmatprep.subr.bf16.mxu0 %v2183_v4 }
  0xb1   : > { %1977 = vmatpush3.bf16.msra.mxu1 %v2097_v9 }
  0xb2   : > { %1978 = vmatprep.subr.bf16.mxu1 %v2183_v4 }
  0xb3   : > { %1917 = vmatpush3.bf16.msra.mxu0 %v2080_v51 }
  0xb4   : > { %1934 = vmatprep.subr.bf16.mxu0 %v2183_v4 }
  0xb5   : > { %1979 = vmatpush3.bf16.msra.mxu1 %v2098_v11 }
  0xb6   : > { %1919 = vmatmul.mubr.msk.bf16.vlgmr.msra.gmra.mrb[8].mxu0 %vm445_vm0, %v859_v52  ;;  %1980 = vmatprep.subr.bf16.mxu1 %v2183_v4  ;;  %v1790_v52 = vld [vmem:[%s2704_s3] ss:$0 sm:$0xff] }
  0xb7   : > { %1935 = vmatpush3.bf16.msra.mxu0 %v2082_v53  ;;  %1942 = vmatprep.mubr.msk.bf16.mxu0 %vm2185_vm2, %v2183_v4 }
  0xb8   : > { %1936 = vmatprep.subr.bf16.mxu0 %v2183_v4 }
  0xb9   : > { %1981 = vmatpush3.bf16.msra.mxu1 %v2099_v12 }
  0xba   : > { %1982 = vmatprep.subr.bf16.mxu1 %v2183_v4 }
  0xbb   : > { %1937 = vmatpush3.bf16.msra.mxu0 %v2084_v54 }
  0xbc   : > { %1938 = vmatprep.subr.bf16.mxu0 %v2183_v4 }
  0xbd   : > { %1983 = vmatpush3.bf16.msra.mxu1 %v2100_v20 }
  0xbe   : > { %1984 = vmatprep.subr.bf16.mxu1 %v2183_v4 }
  0xbf   : > { %1939 = vmatpush3.bf16.msra.mxu0 %v2086_v55 }
  0xc0   : > { %1940 = vmatprep.subr.bf16.mxu0 %v2183_v4 }
  0xc1   : > { %1985 = vmatpush3.bf16.msra.mxu1 %v2101_v21 }
  0xc3   : > { %1941 = vmatpush3.bf16.msra.mxu0 %v2088_v59 }
  0xc4   : > { %1958 = vmatprep.subr.bf16.mxu0 %v2183_v4 }
  0xc6   : > { %1943 = vmatmul.mubr.msk.bf16.vlgmr.msra.gmra.mrb[12].mxu0 %vm445_vm0, %v2403_v39  ;;  %v2093_v39 = vld [vmem:[%s2703_s2 + $0x118] sm:$0xff]  }
  0xc7   : > { %1959 = vmatpush3.bf16.msra.mxu0 %v2090_v60  ;;  %1966 = vmatprep.mubr.msk.bf16.mxu0 %vm2185_vm2, %v2183_v4 }
  0xc8   : > { %1960 = vmatprep.subr.bf16.mxu0 %v2183_v4 }
  0xcb   : > { %1961 = vmatpush3.bf16.msra.mxu0 %v2091_v61 }
  0xcc   : > { %1962 = vmatprep.subr.bf16.mxu0 %v2183_v4 }
  0xcf   : > { %1963 = vmatpush3.bf16.msra.mxu0 %v2092_v62 }
  0xd0   : > { %1964 = vmatprep.subr.bf16.mxu0 %v2183_v4 }
  0xd3   : > { %1965 = vmatpush3.bf16.msra.mxu0 %v2093_v39 }
  0xd6   : > { %1967 = vmatmul.mubr.msk.bf16.vlgmr.msra.gmra.mrb[16].mxu0 %vm445_vm0, %v1339_v40 }
  0xf6   : > { %v551_v56 = vpop.f32.mrb[0].mxu1 }
  0xf7   : > { %v1884_v63 = vpop.f32.mrb[1].mxu1 }
  0xf8   : > { %v554_v0 = vpop.f32.mrb[2].mxu1 }
  0xf9   : > { %v1885_v57 = vpop.f32.mrb[3].mxu1 }
 0x10c   : > { %v840_v3 = vpop.f32.mrb[4].mxu1 }
 0x10d   : > { %v1908_v5 = vpop.f32.mrb[5].mxu1 }
 0x10e   : > { %v843_v6 = vpop.f32.mrb[6].mxu1 }
 0x10f   : > { %v1909_v7 = vpop.f32.mrb[7].mxu1 }
 0x11c   : > { %v1105_v16 = vpop.f32.mrb[8].mxu1 }
 0x11d   : > { %v1932_v17 = vpop.f32.mrb[9].mxu1 }
 0x11e   : > { %v1108_v18 = vpop.f32.mrb[10].mxu1 }
 0x11f   : > { %v1933_v19 = vpop.f32.mrb[11].mxu1 }
 0x169   : > { %v483_v22 = vpop.f32.mrb[0].mxu0 }
 0x16a   : > { %v552_v23 = vadd.f32 %v551_v56, %v483_v22  ;;  %v1872_v24 = vpop.f32.mrb[1].mxu0 }
 0x16b   : > { %v486_v26 = vpop.f32.mrb[2].mxu0 }
 0x16c   : > { %v555_v27 = vadd.f32 %v554_v0, %v486_v26  ;;  %v1873_v58 = vpop.f32.mrb[3].mxu0 }
 0x177   : > { %v1283_v35 = vpop.f32.mrb[12].mxu1 }
 0x178   : > { %v1956_v13 = vpop.f32.mrb[13].mxu1 }
 0x179   : > { %v740_v25 = vpop.f32.mrb[4].mxu0  ;;  %v1286_v14 = vpop.f32.mrb[14].mxu1 }
 0x17a   : > { %v747_v29 = vadd.f32 %v740_v25, %v552_v23  ;;  %v1896_v31 = vpop.f32.mrb[5].mxu0  ;;  %v1957_v36 = vpop.f32.mrb[15].mxu1 }
 0x17b   : > { %v743_v28 = vpop.f32.mrb[6].mxu0 }
 0x17c   : > { %v748_v32 = vadd.f32 %v743_v28, %v555_v27  ;;  %v847_v33 = vadd.f32 %v840_v3, %v747_v29  ;;  %v1897_v34 = vpop.f32.mrb[7].mxu0 }
 0x17e   : > { %v848_v4 = vadd.f32 %v843_v6, %v748_v32 }
 0x189   : > { %v921_v15 = vpop.f32.mrb[8].mxu0 }
 0x18a   : > { %v928_v37 = vadd.f32 %v921_v15, %v847_v33  ;;  %v1920_v38 = vpop.f32.mrb[9].mxu0 }
 0x18b   : > { %v924_v40 = vpop.f32.mrb[10].mxu0 }
 0x18c   : > { %v929_v41 = vadd.f32 %v924_v40, %v848_v4  ;;  %v1112_v10 = vadd.f32 %v1105_v16, %v928_v37  ;;  %v1921_v42 = vpop.f32.mrb[11].mxu0 }
 0x18e   : > { %v1113_v43 = vadd.f32 %v1108_v18, %v929_v41 }
 0x199   : > { %v1202_v44 = vpop.f32.mrb[12].mxu0 }
 0x19a   : > { %v1209_v45 = vadd.f32 %v1202_v44, %v1112_v10  ;;  %v1944_v46 = vpop.f32.mrb[13].mxu0 }
 0x19b   : > { %v1205_v30 = vpop.f32.mrb[14].mxu0 }
 0x19c   : > { %v1210_v47 = vadd.f32 %v1205_v30, %v1113_v43  ;;  %v1290_v48 = vadd.f32 %v1283_v35, %v1209_v45  ;;  %v1945_v49 = vpop.f32.mrb[15].mxu0 }
 0x19e   : > { %v1291_v50 = vadd.f32 %v1286_v14, %v1210_v47 }
 0x1a9   : > { %v1401_v51 = vpop.f32.mrb[16].mxu0 }
 0x1aa   : > { %v1408_v53 = vadd.f32 %v1401_v51, %v1290_v48  ;;  %v1968_v54 = vpop.f32.mrb[17].mxu0 }
 0x1ab   : > { %v1404_v55 = vpop.f32.mrb[18].mxu0 }
 0x1ac   : > { %v1417_v59 = vadd.f32 %v1790_v52, %v1408_v53  ;;  %v1409_v60 = vadd.f32 %v1404_v55, %v1291_v50  ;;  %v1969_v61 = vpop.f32.mrb[19].mxu0 }
 0x1ae   : > { %v1421_v62 = vmul.f32 0.2, %v1417_v59  ;;  %v1418_v39 = vadd.f32 %v1790_v52, %v1409_v60  ;;  %vm1419_vm9 = vcmp.gt.f32.partialorder %v1417_v59, 0.0 }
 0x1b0   : > { %vm1420_vm10 = vcmp.gt.f32.partialorder %v1418_v39, 0.0  ;;  %v1422_v56 = vmul.f32 0.2, %v1418_v39  ;;  %v1423_v63 = vsel %vm1419_vm9, %v1417_v59, %v1421_v62 }
 0x1b2   : > { %v1424_v0 = vsel %vm1420_vm10, %v1418_v39, %v1422_v56 }
 0x1b3   : > { %v1425_v57 = vpack.c.bf16 %v1424_v0, %v1423_v63 }
 0x1b5   : > { %1987 = vmatmul.mubr.bf16.vlgmr.msra.gmra.mrb[16].mxu1 %v1425_v57 }
 0x288   : > { %v1531_v2 = vpop.f32.mrb[16].mxu1 }
 0x289   : > { %v1532_v3 = vadd.f32 %v1791_v1, %v1531_v2  ;;  %v1988_v5 = vpop.f32.mrb[17].mxu1 }
 0x28a   : > { %v1534_v6 = vpop.f32.mrb[18].mxu1 }
 0x28b   : > { %vm1538_vm11 = vcmp.gt.f32.partialorder %v1532_v3, 0.0  ;;  %v1540_v7 = vmul.f32 0.2, %v1532_v3  ;;  %v1535_v8 = vadd.f32 %v1791_v1, %v1534_v6  ;;  %v1989_v9 = vpop.f32.mrb[19].mxu1 }
 0x28d   : > { %v1542_v11 = vsel %vm1538_vm11, %v1532_v3, %v1540_v7  ;;  %vm1539_vm12 = vcmp.gt.f32.partialorder %v1535_v8, 0.0  ;;  %v1541_v12 = vmul.f32 0.2, %v1535_v8 }
 0x28e   : > { %v1546_v16 = vcombine.high %v1542_v11, %v1542_v11  ;;  %1550 = vst [vmem:[%s331_s30] sm:$0xf] %v1542_v11 }
 0x28f   : > { %v1543_v17 = vsel %vm1539_vm12, %v1535_v8, %v1541_v12 }
 0x290   : > { %1551 = vst [vmem:[%s331_s30 + $0x4] sm:$0xf] %v1546_v16  ;;  %v1547_v18 = vcombine.high %v1543_v17, %v1543_v17  ;;  %1552 = vst [vmem:[%s331_s30 + $0x8] sm:$0xf] %v1543_v17 }
 0x292   : > { %1553 = vst [vmem:[%s331_s30 + $0xc] sm:$0xf] %v1547_v18 }
 0x293   : > { %2115 = shalt.err (!%p2112_p5)
}
 0x294   : > { %s2116_s27 = scalar_lea.hbm %s2651_s15, 256  ;;  %s2120_s30 = scalar_lea.hbm %s2707_s6, 512 }
 0x295   : > { %p2117_p6 = scmp.ne.s32.totalorder %s2651_s15, %s2116_s27  ;;  %p2121_p10 = scmp.lt.u32.totalorder %s2651_s15, %s2707_s6 }
 0x296   : > { %p2122_p11 = scmp.lt.u32.totalorder %s2120_s30, %s2116_s27  ;;  %p2124_p13 = scmp.lt.u32.totalorder %s2116_s27, %s2651_s15 }
 0x297   : > { %p2118_p7 = pnand %p2117_p6, %p2263_p4 }
 0x298   : > { %p2123_p12 = por %p2122_p11, %p2121_p10 }
 0x299   : > { %p2119_p9 = pneg %p2118_p7 }
 0x29a   : > { %p2125_p0 = por %p2124_p13, %p2123_p12 }
 0x29c   : > { %p2126_p1 = pnand %p2125_p0, %p2119_p9 }
 0x29e   : > { %2129 = shalt.err (!%p2126_p1)
}
 0x29f   : > { %s2187_s14 = smov 4  }
 0x2a0   : > { %1992 = dma.vmem_to_hbm [thread:$0]  (%p2263_p4), %s2646_s8, 256, %s2651_s15, %s2653_s16, %s2184_s20, %s2184_s20, %s2187_s14  }
 0x2a1 PF: > { %p1999_p2 = scmp.ge.s32.totalorder %s2180_s26, 2  ;;  %s1585_s24 = sand.u32 1, %s2160_s21  }
 0x2a2   : > { %s1586_s17 = scalar_lea.sflag [#allocation3], %s1585_s24 }
 0x2a3   : > { %p1995_p3 = pnand %p1999_p2, %p2270_p8 }
 0x2a5   : > { %2155 = dma.done.wait (!%p1995_p3), %s1586_s17, 256  }
 0x2a6   : > { %2157 = vsyncadd (!%p1995_p3), %s1586_s17, 4294967040  ;;  %s19_s26 = sadd.s32 1, %s2180_s26   ;;  %s2712_s21 = smov %s2164_s22 }
 0x2a7   : > { %p16_p5 = scmp.ge.s32.totalorder %s19_s26, 4   ;;  %s2713_s22 = smov %s2168_s23 }
 0x2a8   : > { %s2714_s23 = smov %s2276_s10  ;;  %s2715_s24 = smov %s2176_s25 }
 0x2a9   : > { %s2716_s25 = smov %s2718_s29  ;;  %18 = sbr.rel (!%p16_p5) target bundleno = 4 (0x4), region = 90 }
 0x2b0   :  { %1591 = vsyncpa [#allocation3], 1 }
 0x2b1   :  { %1593 = vsyncpa [#allocation3 + $0x1], 1 }

</bundles_post_ra>
